<compile_context>
chip_gen: v6e
topology: v6e:2x2x1
jax: 0.10.0
libtpu: 0.0.40
codegen_flags: <defaults>
</compile_context>

<pallas_src>
import jax
import jax.numpy as jnp
import numpy as np
from jax import lax
from jax.experimental import pallas as pl
from jax.experimental.pallas import tpu as pltpu


# ---------------------------------------------------------------------------
# VMEM policy (per TPU generation)
# ---------------------------------------------------------------------------
def _tpu_vmem_capacity_bytes():
    try:
        info = pltpu.get_tpu_info()
        cap = getattr(info, "vmem_capacity_bytes", None)
        if cap:
            return int(cap)
    except Exception:
        pass
    try:
        kind = jax.devices()[0].device_kind.lower()
        if "v7" in kind:
            return 64 << 20
    except Exception:
        pass
    return 128 << 20


def _vmem_policy():
    cap = _tpu_vmem_capacity_bytes()
    if cap <= (64 << 20):
        # v7x-class: 64 MiB VMEM, 2 TensorCores/chip -> smaller tiles, nbt >= 2.
        return {"budget": 24 << 20, "limit": 40 << 20, "min_tiles": 2}
    # v5e / v6e: 128 MiB physical VMEM (default scoped limit is only 16/32 MiB).
    return {"budget": 48 << 20, "limit": 80 << 20, "min_tiles": 1}


# ---------------------------------------------------------------------------
# Fused scaled-dot-product attention (+ optional cross-head residual)
# ---------------------------------------------------------------------------
def _make_attn_kernel(inv_reg, has_pad, has_ctx, compute_residual):
    """One grid step = (batch tile, one head). Head axis is innermost ('arbitrary')."""

    def kernel(*refs):
        i = 0
        q_ref = refs[i]; i += 1
        k_ref = refs[i]; i += 1
        v_ref = refs[i]; i += 1
        pad_ref = ctx_ref = None
        if has_pad:
            pad_ref = refs[i]; i += 1
        if has_ctx:
            ctx_ref = refs[i]; i += 1
        out_ref = refs[i]; i += 1
        attn_ref = refs[i]; i += 1
        res_ref = s_sc = None
        if compute_residual:
            res_ref = refs[i]; i += 1
            s_sc = refs[i]; i += 1

        h = pl.program_id(1)

        if compute_residual:
            @pl.when(h == 0)
            def _():
                s_sc[...] = jnp.zeros_like(s_sc)
                res_ref[...] = jnp.zeros_like(res_ref)

        # scores = (q @ k^T) / sqrt(d_k): contract the last (lane) axes directly,
        # batched over the batch-tile axis; operands stay in their native dtype
        # (bf16 feeds the MXU on the MHA path), accumulation in f32.
        s = jnp.einsum("bqd,bkd->bqk", q_ref[...], k_ref[...],
                       preferred_element_type=jnp.float32) * inv_reg

        pad = None
        if has_pad:
            # compact (bt, 1|Lq, Lk) int8 mask; implicit broadcast inside where().
            pad = pad_ref[...].astype(jnp.int32) != 0
            s = jnp.where(pad, jnp.float32(-1.0e9), s)

        # numerically stable softmax over the key axis (exact division for parity
        # with torch softmax).
        s = s - jnp.max(s, axis=-1, keepdims=True)
        e = jnp.exp(s)
        attn = e / jnp.sum(e, axis=-1, keepdims=True)

        # torch does a second masked_fill(0) AFTER softmax, then context multiply.
        if has_pad:
            attn = jnp.where(pad, jnp.float32(0.0), attn)
        if has_ctx:
            attn = attn * ctx_ref[...].astype(jnp.float32)

        if compute_residual:
            # sum_{m != n} |A_m * A_n| = (sum_m |A_m|)^2 - sum_m A_m^2 (elementwise)
            # Only sum_m |A_m| needs a full tile; sum_m sum_elem A_m^2 is separable
            # so it is accumulated as a scalar directly in the residual output.
            s_sc[...] += jnp.abs(attn)
            res_ref[...] = res_ref[...] - jnp.sum(attn * attn)

        attn_ref[...] = attn.astype(attn_ref.dtype)
        out_ref[...] = jnp.einsum(
            "bqk,bkd->bqd", attn.astype(v_ref.dtype), v_ref[...],
            preferred_element_type=jnp.float32).astype(out_ref.dtype)

        if compute_residual:
            @pl.when(h == pl.num_programs(1) - 1)
            def _():
                res_ref[...] = res_ref[...] + jnp.sum(s_sc[...] * s_sc[...])

    return kernel


def _pick_batch_tile(batch, lq, lk, dk, dv, *, in_dtype, out_dtype, attn_dtype,
                     pad_mask_shape=None, ctx_mask_info=None,
                     compute_residual=True, budget_bytes=48 << 20, min_tiles=1):
    """Largest batch tile whose working set fits the per-generation VMEM budget.

    Inputs / outputs are counted double-buffered (pipelining); scratch single."""
    isz = jnp.dtype(in_dtype).itemsize
    osz = jnp.dtype(out_dtype).itemsize
    asz = jnp.dtype(attn_dtype).itemsize
    per_b = 2 * isz * (lq * dk + lk * dk + lk * dv)       # q, k, v
    per_b += 2 * osz * lq * dv                            # context output
    per_b += 2 * asz * lq * lk                            # attention output
    if compute_residual:
        per_b += 4 * lq * lk                              # s_sc scratch (single-buffered)
    if pad_mask_shape is not None:
        _, mq, mk = pad_mask_shape
        per_b += 2 * 1 * mq * mk                          # int8 pad mask
    if ctx_mask_info is not None:
        (cq, ck), csz = ctx_mask_info
        per_b += 2 * csz * cq * ck
    bt = max(1, min(batch, budget_bytes // max(per_b, 1)))
    bt = min(bt, max(1, batch // max(min_tiles, 1)))      # nbt >= min_tiles (v7x: 2 TCs)
    while batch % bt:                                     # must divide batch
        bt -= 1
    return bt


def _mask_spec(mask, bt, nbt, batch, num_head, packed_heads):
    mq, mk = mask.shape[1], mask.shape[2]
    if mask.shape[0] == batch:
        # compact per-(original)batch mask, shared across heads
        return pl.BlockSpec((bt, mq, mk), lambda bi, h: (bi, 0, 0))
    assert not packed_heads and mask.shape[0] == num_head * batch, (
        "mask leading dim must be batch (compact) or num_head*batch (head-major)")
    return pl.BlockSpec((bt, mq, mk), lambda bi, h: (h * nbt + bi, 0, 0))


def _attention_core(q, k, v, *, d_k, num_head, pad_mask=None, context_mask=None,
                    packed_heads=False, compute_residual=True, attn_dtype=None):
    """Shared fused-attention pallas_call.

    packed_heads=False: q/k/v are (num_head*batch, L, d) head-major (torch bmm
      layout); outputs match that layout.
    packed_heads=True:  q/k/v are (batch, L, num_head*d); the context is written
      as (batch, Lq, num_head*d) and the attention as (batch, num_head, Lq, Lk).
    """
    if packed_heads:
        batch, Lq, dm_q = q.shape
        _, Lk, dm_v = v.shape
        assert dm_q % num_head == 0 and dm_v % num_head == 0
        dk = dm_q // num_head
        dv = dm_v // num_head
    else:
        B, Lq, dk = q.shape
        assert B % num_head == 0, "leading dim must be num_head * batch (head-major)"
        batch = B // num_head
        _, Lk, dv = v.shape

    inv_reg = float(1.0 / np.sqrt(d_k))
    attn_dtype = q.dtype if attn_dtype is None else attn_dtype
    has_pad = pad_mask is not None
    has_ctx = context_mask is not None
    if has_pad:
        pad_mask = (jnp.asarray(pad_mask) != 0).astype(jnp.int8)   # compact int8
    if has_ctx:
        context_mask = jnp.asarray(context_mask)

    policy = _vmem_policy()
    bt = _pick_batch_tile(
        batch, Lq, Lk, dk, dv,
        in_dtype=q.dtype, out_dtype=q.dtype, attn_dtype=attn_dtype,
        pad_mask_shape=(pad_mask.shape if has_pad else None),
        ctx_mask_info=((context_mask.shape[1:], jnp.dtype(context_mask.dtype).itemsize)
                       if has_ctx else None),
        compute_residual=compute_residual,
        budget_bytes=policy["budget"], min_tiles=policy["min_tiles"])
    nbt = batch // bt

    if packed_heads:
        qkv_map = lambda bi, h: (bi, 0, h)        # head indexed in the feature dim
    else:
        qkv_map = lambda bi, h: (h * nbt + bi, 0, 0)

    in_specs = [pl.BlockSpec((bt, Lq, dk), qkv_map),
                pl.BlockSpec((bt, Lk, dk), qkv_map),
                pl.BlockSpec((bt, Lk, dv), qkv_map)]
    inputs = [q, k, v]
    if has_pad:
        in_specs.append(_mask_spec(pad_mask, bt, nbt, batch, num_head, packed_heads))
        inputs.append(pad_mask)
    if has_ctx:
        in_specs.append(_mask_spec(context_mask, bt, nbt, batch, num_head, packed_heads))
        inputs.append(context_mask)

    if packed_heads:
        out_shapes = [jax.ShapeDtypeStruct((batch, Lq, num_head * dv), q.dtype),
                      jax.ShapeDtypeStruct((batch, num_head, Lq, Lk), attn_dtype)]
        out_specs = [pl.BlockSpec((bt, Lq, dv), qkv_map),
                     pl.BlockSpec((bt, None, Lq, Lk), lambda bi, h: (bi, h, 0, 0))]
    else:
        out_shapes = [jax.ShapeDtypeStruct((num_head * batch, Lq, dv), q.dtype),
                      jax.ShapeDtypeStruct((num_head * batch, Lq, Lk), attn_dtype)]
        out_specs = [pl.BlockSpec((bt, Lq, dv), qkv_map),
                     pl.BlockSpec((bt, Lq, Lk), qkv_map)]

    scratch = []
    if compute_residual:
        # (nbt, 1, 1) so the last-two block dims equal the full array dims.
        out_shapes.append(jax.ShapeDtypeStruct((nbt, 1, 1), jnp.float32))
        out_specs.append(pl.BlockSpec((1, 1, 1), lambda bi, h: (bi, 0, 0)))
        scratch.append(pltpu.VMEM((bt, Lq, Lk), jnp.float32))   # sum_m |A_m|

    kernel = _make_attn_kernel(inv_reg, has_pad, has_ctx, compute_residual)
    results = pl.pallas_call(
        kernel,
        out_shape=tuple(out_shapes),
        grid_spec=pltpu.PrefetchScalarGridSpec(
            num_scalar_prefetch=0,
            grid=(nbt, num_head),                 # head axis innermost
            in_specs=in_specs,
            out_specs=tuple(out_specs),
            scratch_shapes=scratch,
        ),
        compiler_params=pltpu.CompilerParams(
            dimension_semantics=("parallel", "arbitrary"),
            vmem_limit_bytes=policy["limit"]),
    )(*inputs)

    if compute_residual:
        out, attn, res_part = results
        return out, attn, res_part
    out, attn = results
    return out, attn, None


def scaled_dot_product_attention(q, k, v, d_k, num_head,
                                 pad_mask=None, context_mask=None,
                                 attn_dtype=None):
    """Pallas implementation of ScaledDotProductAttention.forward (eval mode).

    q, k, v: (num_head * batch, L, d) head-major.  Masks: (batch, 1|Lq, Lk)
    shared across heads (or (num_head*batch, ...) if already expanded).
    Returns (output, attention, residual).
    """
    out, attn, res_part = _attention_core(
        q, k, v, d_k=d_k, num_head=num_head, pad_mask=pad_mask,
        context_mask=context_mask, packed_heads=False,
        compute_residual=True, attn_dtype=attn_dtype)
    Lq = q.shape[1]
    if num_head > 1:
        residual = jnp.sum(res_part) / jnp.float32(Lq * num_head * num_head * 2)
    else:
        residual = jnp.float32(0.0)
    return out, attn, residual


# ---------------------------------------------------------------------------
# Linear projection and (output-proj + residual + LayerNorm) kernels
# ---------------------------------------------------------------------------
def _pick_row_tile(n, max_rows=2048):
    if n <= max_rows:
        return n
    for t in range(max_rows, 7, -8):
        if n % t == 0:
            return t
    return n


def _linear_kernel(x_ref, w_ref, b_ref, y_ref):
    # y = x @ W + b   with W pre-transposed to (d_in, d_out); f32 accumulation.
    y = jnp.dot(x_ref[...], w_ref[...], preferred_element_type=jnp.float32)
    y = y + b_ref[...].astype(jnp.float32)
    y_ref[...] = y.astype(y_ref.dtype)


def _linear(x, w_t, b, out_dtype=None):
    n, d_in = x.shape
    d_out = w_t.shape[1]
    out_dtype = x.dtype if out_dtype is None else out_dtype
    rt = _pick_row_tile(n)
    return pl.pallas_call(
        _linear_kernel,
        out_shape=jax.ShapeDtypeStruct((n, d_out), out_dtype),
        grid_spec=pltpu.PrefetchScalarGridSpec(
            num_scalar_prefetch=0,
            grid=(n // rt,),
            in_specs=[
                pl.BlockSpec((rt, d_in), lambda i: (i, 0)),
                pl.BlockSpec((d_in, d_out), lambda i: (0, 0)),
                pl.BlockSpec((1, d_out), lambda i: (0, 0)),
            ],
            out_specs=pl.BlockSpec((rt, d_out), lambda i: (i, 0)),
        ),
        compiler_params=pltpu.CompilerParams(dimension_semantics=("parallel",)),
    )(x, w_t, b.reshape(1, d_out))


def _out_norm_kernel(o_ref, wo_ref, bo_ref, x_ref, g_ref, beta_ref, y_ref):
    # y = LayerNorm(o @ Wo + bo + X)   (dropout is identity in eval mode)
    o = o_ref[...].astype(jnp.float32)
    h = jnp.dot(o, wo_ref[...], preferred_element_type=jnp.float32)
    h = h + bo_ref[...].astype(jnp.float32) + x_ref[...].astype(jnp.float32)
    mu = jnp.mean(h, axis=-1, keepdims=True)
    var = jnp.mean(jnp.square(h - mu), axis=-1, keepdims=True)
    hn = (h - mu) * lax.rsqrt(var + jnp.float32(1e-5))
    y = hn * g_ref[...].astype(jnp.float32) + beta_ref[...].astype(jnp.float32)
    y_ref[...] = y.astype(y_ref.dtype)


def _out_norm(o, wo_t, bo, x, gamma, beta):
    n, d_in = o.shape
    d_x = wo_t.shape[1]
    rt = _pick_row_tile(n)
    return pl.pallas_call(
        _out_norm_kernel,
        out_shape=jax.ShapeDtypeStruct((n, d_x), x.dtype),
        grid_spec=pltpu.PrefetchScalarGridSpec(
            num_scalar_prefetch=0,
            grid=(n // rt,),
            in_specs=[
                pl.BlockSpec((rt, d_in), lambda i: (i, 0)),
                pl.BlockSpec((d_in, d_x), lambda i: (0, 0)),
                pl.BlockSpec((1, d_x), lambda i: (0, 0)),
                pl.BlockSpec((rt, d_x), lambda i: (i, 0)),
                pl.BlockSpec((1, d_x), lambda i: (0, 0)),
                pl.BlockSpec((1, d_x), lambda i: (0, 0)),
            ],
            out_specs=pl.BlockSpec((rt, d_x), lambda i: (i, 0)),
        ),
        compiler_params=pltpu.CompilerParams(dimension_semantics=("parallel",)),
    )(o, wo_t, bo.reshape(1, d_x), x, gamma.reshape(1, d_x), beta.reshape(1, d_x))


# ---------------------------------------------------------------------------
# Full MultiHeadAttention forward
# ---------------------------------------------------------------------------
def multi_head_attention(q, k, v, params, num_head, d_k, pad_mask=None,
                         compute_dtype=jnp.bfloat16):
    """MultiHeadAttention.forward (eval mode). Returns (output, attention).

    The attention/context matmuls run in `compute_dtype` (bf16 by default for
    MXU rate + halved HBM traffic); LayerNorm and the residual add stay in f32.
    """
    batch, Lq, d_x = q.shape
    _, Lk, _ = k.shape
    X = q.reshape(batch * Lq, d_x)

    # Pre-transpose weights once to (d_in, d_out): the MXU sees a plain (K, N) RHS.
    wq_t = jnp.transpose(params["wq_w"])
    wk_t = jnp.transpose(params["wk_w"])
    wv_t = jnp.transpose(params["wv_w"])
    wo_t = jnp.transpose(params["wo_w"])

    # Projections emit compute_dtype directly (no separate cast pass).
    qp = _linear(q.reshape(batch * Lq, d_x), wq_t, params["wq_b"], out_dtype=compute_dtype)
    kp = _linear(k.reshape(batch * Lk, d_x), wk_t, params["wk_b"], out_dtype=compute_dtype)
    vp = _linear(v.reshape(batch * Lk, d_x), wv_t, params["wv_b"], out_dtype=compute_dtype)

    # No head-split transposes: heads are indexed through BlockSpecs on the
    # (batch, L, num_head*d_k) layout; the context comes back already in the
    # concatenated-head layout and attention as (batch, num_head, Lq, Lk).
    ctx, attention, _ = _attention_core(
        qp.reshape(batch, Lq, num_head * d_k),
        kp.reshape(batch, Lk, num_head * d_k),
        vp.reshape(batch, Lk, num_head * d_k),
        d_k=d_k, num_head=num_head, pad_mask=pad_mask,
        packed_heads=True, compute_residual=False, attn_dtype=compute_dtype)

    y = _out_norm(ctx.reshape(batch * Lq, num_head * d_k), wo_t, params["wo_b"],
                  X, params["ln_g"], params["ln_b"]).reshape(batch, Lq, d_x)
    return y, attention


# ---------------------------------------------------------------------------
# Pure-JAX references
# ---------------------------------------------------------------------------
def _ref_sdpa(q, k, v, d_k, num_head, pad_mask=None, context_mask=None):
    B, Lq, _ = q.shape
    Lk = k.shape[1]
    batch = B // num_head
    s = jnp.einsum("bqd,bkd->bqk", q, k) / np.sqrt(d_k)
    pm = None
    if pad_mask is not None:
        pm = jnp.tile(jnp.asarray(pad_mask).astype(bool), (num_head, 1, 1))
        s = jnp.where(pm, -1.0e9, s)
    a = jax.nn.softmax(s, axis=-1)
    if pm is not None:
        a = jnp.where(pm, 0.0, a)
    if context_mask is not None:
        a = a * jnp.tile(jnp.asarray(context_mask), (num_head, 1, 1))
    out = jnp.einsum("bqk,bkd->bqd", a, v)
    a4 = a.reshape(num_head, batch, Lq, Lk)
    res = 0.0
    for m in range(num_head):
        for n in range(num_head):
            if m != n:
                res = res + jnp.sum(jnp.abs(a4[m] * a4[n])) / Lq
    res = res / num_head / num_head / 2.0
    return out, a, res


def _ref_mha(q, k, v, p, num_head, d_k, pad_mask=None):
    batch, Lq, d_x = q.shape
    Lk = k.shape[1]
    lin = lambda x, w, b: jnp.einsum("bld,od->blo", x, w) + b
    qp = lin(q, p["wq_w"], p["wq_b"]).reshape(batch, Lq, num_head, d_k)
    kp = lin(k, p["wk_w"], p["wk_b"]).reshape(batch, Lk, num_head, d_k)
    vp = lin(v, p["wv_w"], p["wv_b"]).reshape(batch, Lk, num_head, d_k)
    qh = jnp.transpose(qp, (2, 0, 1, 3)).reshape(-1, Lq, d_k)
    kh = jnp.transpose(kp, (2, 0, 1, 3)).reshape(-1, Lk, d_k)
    vh = jnp.transpose(vp, (2, 0, 1, 3)).reshape(-1, Lk, d_k)
    out, attn, _ = _ref_sdpa(qh, kh, vh, d_k, num_head, pad_mask=pad_mask)
    out = jnp.transpose(out.reshape(num_head, batch, Lq, d_k),
                        (1, 2, 0, 3)).reshape(batch, Lq, num_head * d_k)
    h = jnp.einsum("blo,do->bld", out, p["wo_w"]) + p["wo_b"] + q
    mu = h.mean(-1, keepdims=True)
    var = ((h - mu) ** 2).mean(-1, keepdims=True)
    y = (h - mu) / jnp.sqrt(var + 1e-5) * p["ln_g"] + p["ln_b"]
    attn = jnp.transpose(attn.reshape(num_head, batch, Lq, Lk), (1, 0, 2, 3))
    return y, attn


# ---------------------------------------------------------------------------
if __name__ == "__main__":
    num_head = 2
    batch = 2
    Lq = Lk = 128          # lane/sublane aligned sequence lengths
    d_k = 128              # feature dims map to full 128-wide TPU lanes
    d_x = 128

    root = jax.random.PRNGKey(0)
    ks = jax.random.split(root, 16)

    # ---- standalone ScaledDotProductAttention (head-major batching), no masks ----
    B = num_head * batch
    q_h = jax.random.normal(ks[0], (B, Lq, d_k), dtype=jnp.float32)
    k_h = jax.random.normal(ks[1], (B, Lk, d_k), dtype=jnp.float32)
    v_h = jax.random.normal(ks[2], (B, Lk, d_k), dtype=jnp.float32)

    out, attn, res = scaled_dot_product_attention(q_h, k_h, v_h, d_k=d_k, num_head=num_head)
    jax.block_until_ready((out, attn, res))
    r_out, r_attn, r_res = _ref_sdpa(q_h, k_h, v_h, d_k, num_head)
    np.testing.assert_allclose(np.asarray(out), np.asarray(r_out), rtol=5e-3, atol=2e-3)
    np.testing.assert_allclose(np.asarray(attn), np.asarray(r_attn), rtol=5e-3, atol=5e-4)
    np.testing.assert_allclose(float(res), float(r_res), rtol=5e-3, atol=2e-3)

    # ---- masked variant: compact (batch, 1, Lk) pad mask + (batch, Lq, Lk) context mask ----
    key_lens = jnp.array([Lk - 16, Lk])
    pad_mask = jnp.arange(Lk)[None, None, :] >= key_lens[:, None, None]   # bool (batch, 1, Lk)
    context_mask = jax.random.uniform(ks[3], (batch, Lq, Lk), dtype=jnp.float32,
                                      minval=0.5, maxval=1.5)

    out, attn, res = scaled_dot_product_attention(
        q_h, k_h, v_h, d_k=d_k, num_head=num_head,
        pad_mask=pad_mask, context_mask=context_mask)
    jax.block_until_ready((out, attn, res))
    r_out, r_attn, r_res = _ref_sdpa(q_h, k_h, v_h, d_k, num_head, pad_mask, context_mask)
    np.testing.assert_allclose(np.asarray(out), np.asarray(r_out), rtol=5e-3, atol=2e-3)
    np.testing.assert_allclose(np.asarray(attn), np.asarray(r_attn), rtol=5e-3, atol=5e-4)
    np.testing.assert_allclose(float(res), float(r_res), rtol=5e-3, atol=2e-3)

    # ---- full MultiHeadAttention forward (bf16 MXU path) ----
    q_in = jax.random.normal(ks[4], (batch, Lq, d_x), dtype=jnp.float32)
    k_in = jax.random.normal(ks[5], (batch, Lk, d_x), dtype=jnp.float32)
    v_in = jax.random.normal(ks[6], (batch, Lk, d_x), dtype=jnp.float32)

    def xavier(key, shape):
        fan_out, fan_in = shape
        return jax.random.normal(key, shape, dtype=jnp.float32) * np.sqrt(2.0 / (fan_in + fan_out))

    params = {
        "wq_w": xavier(ks[7], (num_head * d_k, d_x)),
        "wq_b": 0.02 * jax.random.normal(ks[8], (num_head * d_k,), dtype=jnp.float32),
        "wk_w": xavier(ks[9], (num_head * d_k, d_x)),
        "wk_b": 0.02 * jax.random.normal(ks[10], (num_head * d_k,), dtype=jnp.float32),
        "wv_w": xavier(ks[11], (num_head * d_k, d_x)),
        "wv_b": 0.02 * jax.random.normal(ks[12], (num_head * d_k,), dtype=jnp.float32),
        "wo_w": xavier(ks[13], (d_x, num_head * d_k)),
        "wo_b": 0.02 * jax.random.normal(ks[14], (d_x,), dtype=jnp.float32),
        "ln_g": jnp.ones((d_x,), jnp.float32)
                + 0.05 * jax.random.normal(ks[15], (d_x,), dtype=jnp.float32),
        "ln_b": jnp.zeros((d_x,), jnp.float32),
    }

    y, attn_mha = multi_head_attention(q_in, k_in, v_in, params,
                                       num_head=num_head, d_k=d_k, pad_mask=pad_mask)
    jax.block_until_ready((y, attn_mha))
    r_y, r_attn_mha = _ref_mha(q_in, k_in, v_in, params, num_head, d_k, pad_mask)
    # bf16 compute path vs. f32 reference -> bf16-level tolerances.
    np.testing.assert_allclose(np.asarray(y), np.asarray(r_y), rtol=3e-2, atol=3e-2)
    np.testing.assert_allclose(np.asarray(attn_mha.astype(jnp.float32)),
                               np.asarray(r_attn_mha), rtol=5e-2, atol=1e-2)

    print("KERNEL_OK")
</pallas_src>

<mosaic_0001>
module attributes {stable_mosaic.version = 11 : i64} {
  func.func @kernel(%arg0: i32, %arg1: i32, %arg2: memref<2x128x128xf32, #tpu.memory_space<vmem>>, %arg3: memref<2x128x128xf32, #tpu.memory_space<vmem>>, %arg4: memref<2x128x128xf32, #tpu.memory_space<vmem>>, %arg5: memref<2x128x128xf32, #tpu.memory_space<vmem>>, %arg6: memref<2x128x128xf32, #tpu.memory_space<vmem>>, %arg7: memref<1x1x1xf32, #tpu.memory_space<vmem>>, %arg8: memref<2x128x128xf32, #tpu.memory_space<vmem>>) attributes {dimension_semantics = [#tpu.dimension_semantics<parallel>, #tpu.dimension_semantics<arbitrary>], iteration_bounds = array<i64: 1, 2>, scalar_prefetch = 0 : i64, scratch_operands = 1 : i64, tpu.core_type = #tpu.core_type<tc>, window_params = [{transform_indices = @transform_0, window_bounds = array<i64: 2, 128, 128>}, {transform_indices = @transform_1, window_bounds = array<i64: 2, 128, 128>}, {transform_indices = @transform_2, window_bounds = array<i64: 2, 128, 128>}, {transform_indices = @transform_3, window_bounds = array<i64: 2, 128, 128>}, {transform_indices = @transform_4, window_bounds = array<i64: 2, 128, 128>}, {transform_indices = @transform_5, window_bounds = array<i64: 1, 1, 1>}]} {
    %c0_i32 = arith.constant 0 : i32
    %0 = arith.cmpi eq, %arg1, %c0_i32 : i32
    %1 = arith.extui %0 : i1 to i32
    %c0_i32_0 = arith.constant 0 : i32
    %2 = arith.cmpi ne, %1, %c0_i32_0 : i32
    scf.if %2 {
      %cst_33 = arith.constant 0.000000e+00 : f32
      %37 = vector.broadcast %cst_33 : f32 to vector<2x128x128xf32>
      %c0_34 = arith.constant 0 : index
      %c0_35 = arith.constant 0 : index
      %c0_36 = arith.constant 0 : index
      %38 = vector.load %arg8[%c0_34, %c0_35, %c0_36] : memref<2x128x128xf32, #tpu.memory_space<vmem>>, vector<2x128x128xf32>
      tpu.vector_store %arg8[%c0_34, %c0_35, %c0_36], %37 {strides = array<i32>} : memref<2x128x128xf32, #tpu.memory_space<vmem>>, vector<2x128x128xf32>,
      %cst_37 = arith.constant 0.000000e+00 : f32
      %39 = vector.broadcast %cst_37 : f32 to vector<1x1x1xf32>
      %c0_38 = arith.constant 0 : index
      %c0_39 = arith.constant 0 : index
      %c0_40 = arith.constant 0 : index
      %40 = vector.load %arg7[%c0_38, %c0_39, %c0_40] : memref<1x1x1xf32, #tpu.memory_space<vmem>>, vector<1x1x1xf32>
      tpu.vector_store %arg7[%c0_38, %c0_39, %c0_40], %39 {strides = array<i32>} : memref<1x1x1xf32, #tpu.memory_space<vmem>>, vector<1x1x1xf32>,
    } else {
    }
    %c0 = arith.constant 0 : index
    %c0_1 = arith.constant 0 : index
    %c0_2 = arith.constant 0 : index
    %3 = vector.load %arg2[%c0, %c0_1, %c0_2] : memref<2x128x128xf32, #tpu.memory_space<vmem>>, vector<2x128x128xf32>
    %c0_3 = arith.constant 0 : index
    %c0_4 = arith.constant 0 : index
    %c0_5 = arith.constant 0 : index
    %4 = vector.load %arg3[%c0_3, %c0_4, %c0_5] : memref<2x128x128xf32, #tpu.memory_space<vmem>>, vector<2x128x128xf32>
    "tpu.trace_start"() <{level = 10 : i32, message = "bqd,bkd->bqk"}> : () -> ()
    %cst = arith.constant dense<0.000000e+00> : vector<2x128x128xf32>
    %5 = tpu.matmul %3, %4, %cst {dimension_numbers = #tpu.dot_dimension_numbers<[2], [2], [1], [1], [0, 0, 0, 1, 1, 1], [0], [0]>} : vector<2x128x128xf32>, vector<2x128x128xf32>, vector<2x128x128xf32> -> vector<2x128x128xf32>
    "tpu.trace_stop"() : () -> ()
    %cst_6 = arith.constant 0.0883883461 : f32
    %6 = vector.broadcast %cst_6 : f32 to vector<2x128x128xf32>
    %7 = arith.mulf %5, %6 : vector<2x128x128xf32>
    %cst_7 = arith.constant dense<0xFF800000> : vector<2x128xf32>
    %8 = vector.multi_reduction <maximumf>, %7, %cst_7 [2] : vector<2x128x128xf32> to vector<2x128xf32>
    %9 = vector.shape_cast %8 : vector<2x128xf32> to vector<2x128x1xf32>
    %10 = vector.broadcast %9 : vector<2x128x1xf32> to vector<2x128x128xf32>
    %11 = arith.subf %7, %10 : vector<2x128x128xf32>
    %12 = math.exp %11 : vector<2x128x128xf32>
    %cst_8 = arith.constant dense<0.000000e+00> : vector<2x128xf32>
    %13 = vector.multi_reduction <add>, %12, %cst_8 [2] : vector<2x128x128xf32> to vector<2x128xf32>
    %14 = vector.shape_cast %13 : vector<2x128xf32> to vector<2x128x1xf32>
    %15 = vector.broadcast %14 : vector<2x128x1xf32> to vector<2x128x128xf32>
    %16 = arith.divf %12, %15 : vector<2x128x128xf32>
    %c0_9 = arith.constant 0 : index
    %c0_10 = arith.constant 0 : index
    %c0_11 = arith.constant 0 : index
    %17 = vector.load %arg8[%c0_9, %c0_10, %c0_11] : memref<2x128x128xf32, #tpu.memory_space<vmem>>, vector<2x128x128xf32>
    %18 = math.absf %16 : vector<2x128x128xf32>
    %19 = arith.addf %17, %18 : vector<2x128x128xf32>
    %c0_12 = arith.constant 0 : index
    %c0_13 = arith.constant 0 : index
    %c0_14 = arith.constant 0 : index
    %20 = vector.load %arg8[%c0_12, %c0_13, %c0_14] : memref<2x128x128xf32, #tpu.memory_space<vmem>>, vector<2x128x128xf32>
    tpu.vector_store %arg8[%c0_12, %c0_13, %c0_14], %19 {strides = array<i32>} : memref<2x128x128xf32, #tpu.memory_space<vmem>>, vector<2x128x128xf32>,
    %c0_15 = arith.constant 0 : index
    %c0_16 = arith.constant 0 : index
    %c0_17 = arith.constant 0 : index
    %21 = vector.load %arg7[%c0_15, %c0_16, %c0_17] : memref<1x1x1xf32, #tpu.memory_space<vmem>>, vector<1x1x1xf32>
    %22 = arith.mulf %16, %16 : vector<2x128x128xf32>
    %23 = vector.shape_cast %22 : vector<2x128x128xf32> to vector<1x2x128x128xf32>
    %cst_18 = arith.constant dense<0.000000e+00> : vector<1xf32>
    %24 = vector.multi_reduction <add>, %23, %cst_18 [1, 2, 3] : vector<1x2x128x128xf32> to vector<1xf32>
    %25 = vector.shape_cast %24 : vector<1xf32> to vector<1x1x1x1xf32>
    %26 = vector.extract %25[0, 0, 0, 0] : f32 from vector<1x1x1x1xf32>
    %27 = vector.broadcast %26 : f32 to vector<1x1x1xf32>
    %28 = arith.subf %21, %27 : vector<1x1x1xf32>
    %c0_19 = arith.constant 0 : index
    %c0_20 = arith.constant 0 : index
    %c0_21 = arith.constant 0 : index
    %29 = vector.load %arg7[%c0_19, %c0_20, %c0_21] : memref<1x1x1xf32, #tpu.memory_space<vmem>>, vector<1x1x1xf32>
    tpu.vector_store %arg7[%c0_19, %c0_20, %c0_21], %28 {strides = array<i32>} : memref<1x1x1xf32, #tpu.memory_space<vmem>>, vector<1x1x1xf32>,
    %c0_22 = arith.constant 0 : index
    %c0_23 = arith.constant 0 : index
    %c0_24 = arith.constant 0 : index
    %30 = vector.load %arg6[%c0_22, %c0_23, %c0_24] : memref<2x128x128xf32, #tpu.memory_space<vmem>>, vector<2x128x128xf32>
    tpu.vector_store %arg6[%c0_22, %c0_23, %c0_24], %16 {strides = array<i32>} : memref<2x128x128xf32, #tpu.memory_space<vmem>>, vector<2x128x128xf32>,
    %c0_25 = arith.constant 0 : index
    %c0_26 = arith.constant 0 : index
    %c0_27 = arith.constant 0 : index
    %31 = vector.load %arg4[%c0_25, %c0_26, %c0_27] : memref<2x128x128xf32, #tpu.memory_space<vmem>>, vector<2x128x128xf32>
    "tpu.trace_start"() <{level = 10 : i32, message = "bqk,bkd->bqd"}> : () -> ()
    %cst_28 = arith.constant dense<0.000000e+00> : vector<2x128x128xf32>
    %32 = tpu.matmul %16, %31, %cst_28 {dimension_numbers = #tpu.dot_dimension_numbers<[2], [1], [1], [2], [0, 0, 0, 1, 1, 2], [0], [0]>} : vector<2x128x128xf32>, vector<2x128x128xf32>, vector<2x128x128xf32> -> vector<2x128x128xf32>
    "tpu.trace_stop"() : () -> ()
    %c0_29 = arith.constant 0 : index
    %c0_30 = arith.constant 0 : index
    %c0_31 = arith.constant 0 : index
    %33 = vector.load %arg5[%c0_29, %c0_30, %c0_31] : memref<2x128x128xf32, #tpu.memory_space<vmem>>, vector<2x128x128xf32>
    tpu.vector_store %arg5[%c0_29, %c0_30, %c0_31], %32 {strides = array<i32>} : memref<2x128x128xf32, #tpu.memory_space<vmem>>, vector<2x128x128xf32>,
    %c1_i32 = arith.constant 1 : i32
    %34 = arith.cmpi eq, %arg1, %c1_i32 : i32
    %35 = arith.extui %34 : i1 to i32
    %c0_i32_32 = arith.constant 0 : i32
    %36 = arith.cmpi ne, %35, %c0_i32_32 : i32
    scf.if %36 {
      %c0_33 = arith.constant 0 : index
      %c0_34 = arith.constant 0 : index
      %c0_35 = arith.constant 0 : index
      %37 = vector.load %arg7[%c0_33, %c0_34, %c0_35] : memref<1x1x1xf32, #tpu.memory_space<vmem>>, vector<1x1x1xf32>
      %c0_36 = arith.constant 0 : index
      %c0_37 = arith.constant 0 : index
      %c0_38 = arith.constant 0 : index
      %38 = vector.load %arg8[%c0_36, %c0_37, %c0_38] : memref<2x128x128xf32, #tpu.memory_space<vmem>>, vector<2x128x128xf32>
      %c0_39 = arith.constant 0 : index
      %c0_40 = arith.constant 0 : index
      %c0_41 = arith.constant 0 : index
      %39 = vector.load %arg8[%c0_39, %c0_40, %c0_41] : memref<2x128x128xf32, #tpu.memory_space<vmem>>, vector<2x128x128xf32>
      %40 = arith.mulf %38, %39 : vector<2x128x128xf32>
      %41 = vector.shape_cast %40 : vector<2x128x128xf32> to vector<1x2x128x128xf32>
      %cst_42 = arith.constant dense<0.000000e+00> : vector<1xf32>
      %42 = vector.multi_reduction <add>, %41, %cst_42 [1, 2, 3] : vector<1x2x128x128xf32> to vector<1xf32>
      %43 = vector.shape_cast %42 : vector<1xf32> to vector<1x1x1x1xf32>
      %44 = vector.extract %43[0, 0, 0, 0] : f32 from vector<1x1x1x1xf32>
      %45 = vector.broadcast %44 : f32 to vector<1x1x1xf32>
      %46 = arith.addf %37, %45 : vector<1x1x1xf32>
      %c0_43 = arith.constant 0 : index
      %c0_44 = arith.constant 0 : index
      %c0_45 = arith.constant 0 : index
      %47 = vector.load %arg7[%c0_43, %c0_44, %c0_45] : memref<1x1x1xf32, #tpu.memory_space<vmem>>, vector<1x1x1xf32>
      tpu.vector_store %arg7[%c0_43, %c0_44, %c0_45], %46 {strides = array<i32>} : memref<1x1x1xf32, #tpu.memory_space<vmem>>, vector<1x1x1xf32>,
    } else {
    }
    return
  }
  func.func @transform_0(%arg0: i32, %arg1: i32) -> (i32, i32, i32) {
    %c1_i32 = arith.constant 1 : i32
    %0 = arith.muli %arg1, %c1_i32 : i32
    %1 = arith.addi %0, %arg0 : i32
    %c0_i32 = arith.constant 0 : i32
    %c0_i32_0 = arith.constant 0 : i32
    %c0_i32_1 = arith.constant 0 : i32
    return %1, %c0_i32, %c0_i32_0 : i32, i32, i32
  }
  func.func @transform_1(%arg0: i32, %arg1: i32) -> (i32, i32, i32) {
    %c1_i32 = arith.constant 1 : i32
    %0 = arith.muli %arg1, %c1_i32 : i32
    %1 = arith.addi %0, %arg0 : i32
    %c0_i32 = arith.constant 0 : i32
    %c0_i32_0 = arith.constant 0 : i32
    %c0_i32_1 = arith.constant 0 : i32
    return %1, %c0_i32, %c0_i32_0 : i32, i32, i32
  }
  func.func @transform_2(%arg0: i32, %arg1: i32) -> (i32, i32, i32) {
    %c1_i32 = arith.constant 1 : i32
    %0 = arith.muli %arg1, %c1_i32 : i32
    %1 = arith.addi %0, %arg0 : i32
    %c0_i32 = arith.constant 0 : i32
    %c0_i32_0 = arith.constant 0 : i32
    %c0_i32_1 = arith.constant 0 : i32
    return %1, %c0_i32, %c0_i32_0 : i32, i32, i32
  }
  func.func @transform_3(%arg0: i32, %arg1: i32) -> (i32, i32, i32) {
    %c1_i32 = arith.constant 1 : i32
    %0 = arith.muli %arg1, %c1_i32 : i32
    %1 = arith.addi %0, %arg0 : i32
    %c0_i32 = arith.constant 0 : i32
    %c0_i32_0 = arith.constant 0 : i32
    %c0_i32_1 = arith.constant 0 : i32
    return %1, %c0_i32, %c0_i32_0 : i32, i32, i32
  }
  func.func @transform_4(%arg0: i32, %arg1: i32) -> (i32, i32, i32) {
    %c1_i32 = arith.constant 1 : i32
    %0 = arith.muli %arg1, %c1_i32 : i32
    %1 = arith.addi %0, %arg0 : i32
    %c0_i32 = arith.constant 0 : i32
    %c0_i32_0 = arith.constant 0 : i32
    %c0_i32_1 = arith.constant 0 : i32
    return %1, %c0_i32, %c0_i32_0 : i32, i32, i32
  }
  func.func @transform_5(%arg0: i32, %arg1: i32) -> (i32, i32, i32) {
    %c0_i32 = arith.constant 0 : i32
    %c0_i32_0 = arith.constant 0 : i32
    %c0_i32_1 = arith.constant 0 : i32
    return %arg0, %c0_i32, %c0_i32_0 : i32, i32, i32
  }
}

</mosaic_0001>

<bundles_post_ra>
// kernel: tpu_custom_call.1
= control target key start
LH: loop header
LB: loop body
LE: loop exit
PB: predicated region body
PF: predicated region fallthrough
CT: control target
= control target key end

     0   :  { %s3739_s0 = inlined_call_operand.hbm [shape: f32[4,128,128], index: 0, kind: input, shape index: {}]   ;;  %s3740_s1 = inlined_call_operand.hbm [shape: f32[4,128,128], index: 1, kind: input, shape index: {}]   ;;  %s3741_s2 = inlined_call_operand.hbm [shape: f32[4,128,128], index: 2, kind: input, shape index: {}]   ;;  %s3742_s3 = inlined_call_operand.hbm [shape: f32[4,128,128], index: 3, kind: output, shape index: {0}]   ;;  %s3743_s4 = inlined_call_operand.hbm [shape: f32[4,128,128], index: 4, kind: output, shape index: {1}]   ;;  %s3744_s5 = inlined_call_operand.hbm [shape: f32[1,1,1], index: 5, kind: output, shape index: {2}]  }
   0x1   :  { %3754 = sst [smem:[#allocation23_spill]] %s3740_s1 }
   0x2   :  { %11 = vsyncpa [#allocation4], 0 }
   0x3   :  { %13 = vsyncpa [#allocation4 + $0x1], 0 }
   0x4   :  { %14 = vsyncpa [#allocation7], 0 }
   0x5   :  { %16 = vsyncpa [#allocation7 + $0x1], 0 }
   0x6   :  { %17 = vsyncpa [#allocation5], 0 }
   0x7   :  { %19 = vsyncpa [#allocation5 + $0x1], 0 }
   0x8   :  { %20 = vsyncpa [#allocation11], 0 }
   0x9   :  { %22 = vsyncpa [#allocation11 + $0x1], 0  ;;  %s2899_s18 = smov 0   ;;  %s2901_s19 = smov 0  }
   0xa   :  { %s2903_s20 = smov 0   ;;  %s2905_s21 = smov 0  }
   0xb   :  { %s2907_s22 = smov 0   ;;  %s2909_s23 = smov 0  }
   0xc LB: > { %3755 = sst [smem:[#allocation18_spill]] %s2836_s18  ;;  %s2930_s24 = sadd.s32 4294967295, %s2856_s23   ;;  %s2856_s23 = sphi %s2909_s23, %s28_s23   ;;  %s2852_s22 = sphi %s2907_s22, %s3779_s22   ;;  %s2848_s21 = sphi %s2905_s21, %s3778_s21   ;;  %s2844_s20 = sphi %s2903_s20, %s3782_s20   ;;  %s2840_s19 = sphi %s2901_s19, %s3781_s19   ;;  %s2836_s18 = sphi %s2899_s18, %s3780_s18  }
   0xd   : > { %3756 = sst [smem:[#allocation19_spill]] %s2852_s22  ;;  %s3745_s25 = sadd.s32 4294967294, %s2856_s23  }
   0xe   : > { %s37_s26 = sadd.s32 1, %s2852_s22  ;;  %s49_s27 = sadd.s32 1, %s2844_s20 }
   0xf   : > { %p38_p0 = scmp.ge.s32.totalorder %s37_s26, 2  ;;  %p56_p1 = scmp.ne.s32.totalorder %s2844_s20, %s2840_s19 }
  0x10   : > { %p57_p2 = scmp.eq.s32.totalorder %s2856_s23, 0  ;;  %p62_p3 = scmp.ne.s32.totalorder %s2840_s19, %s2836_s18 }
  0x11   : > { %s3784_s26 = smov (%p38_p0, %s37_s26), 0  ;;  %p63_p5 = scmp.eq.s32.totalorder %s2930_s24, 0 }
  0x12   : > { %3757 = sst [smem:[#allocation20_spill]] %s3784_s26  ;;  %p2942_p4 = por %p57_p2, %p56_p1 }
  0x13   : > { %s46_s29 = ssub.s32 %s2852_s22, %s3784_s26  ;;  %p3747_p6 = scmp.eq.s32.totalorder %s2930_s24, 1 }
  0x14   : > { %p47_p7 = scmp.eq.s32.totalorder %s46_s29, 0  ;;  %p2950_p8 = por %p63_p5, %p62_p3 }
  0x15   : > { %p2956_p9 = por %p3747_p6, %p56_p1  ;;  %p150_p10 = scmp.eq.s32.totalorder %s3745_s25, 1 }
  0x16   : > { %s2963_s7 = scalar_select %p47_p7, %s2844_s20, %s49_s27  }
  0x17   : > { %p2965_p11 = por %p150_p10, %p62_p3  ;;  %p2444_p13 = scmp.lt.s32.totalorder %s2856_s23, 2 }
  0x18   : > { %3761 = sst [smem:[#allocation21_spill]] %s2963_s7  ;;  %s3746_s9 = sand.u32 1, %s2844_s20  }
  0x19   : > { %s3762_s8 = scalar_select %p2965_p11, 1, 0 }
  0x1a   : > { %s2974_s10 = sshll.u32 %s3746_s9, 8  ;;  %s2977_s11 = sshll.u32 %s2852_s22, 12 }
  0x1b   : > { %3763 = sst [smem:[#allocation22_spill]] %s3762_s8  ;;  %p2981_p0 = pnand %p2444_p13, %p2942_p4 }
  0x1c   : > { %s247_s13 = sand.u32 1, %s2856_s23   ;;  %s3765_s1 = sld [smem:[#allocation23_spill]] }
  0x1d   : > { %s251_s17 = scalar_lea.vmem [#allocation6], %s2974_s10  ;;  %p2027_p1 = scmp.ge.s32.totalorder %s2856_s23, 1 }
  0x1e   : > { %s260_s27 = sshll.u32 %s251_s17, 4  ;;  %p291_p2 = scmp.lt.s32.totalorder %s2856_s23, 3  ;;  %s261_s27 = int_to_ptr.vmem [resolvable:$true] %s260_s27 }
  0x1f   : > { %s2993_s29 = scalar_lea.sflag [#allocation7], %s247_s13  ;;  %p2632_p3 = pneg %p2981_p0 }
  0x20   : > { %s2643_s28 = scalar_lea.vmem %s261_s27, 4096  ;;  %s2858_s25 = smov [#allocation6]  }
  0x21   : > { %p2644_p4 = scmp.ne.s32.totalorder %s261_s27, %s2643_s28  ;;  %s2648_s9 = sshll.u32 %s2858_s25, 4  ;;  %s2649_s9 = int_to_ptr.vmem [resolvable:$false] %s2648_s9 }
  0x22   : > { %s259_s16 = scalar_lea.hbm %s3765_s1, %s2977_s11  ;;  %s2650_s14 = scalar_lea.vmem %s2649_s9, 8192 }
  0x23   : > { %p2646_p5 = pnand %p2644_p4, %p2632_p3  ;;  %p2651_p10 = scmp.lt.s32.totalorder %s261_s27, %s2649_s9 }
  0x24   : > { %p2652_p13 = scmp.lt.s32.totalorder %s2650_s14, %s2643_s28 }
  0x25   : > { %p2647_p7 = pneg %p2646_p5 }
  0x26   : > { %p2653_p12 = por %p2652_p13, %p2651_p10 }
  0x28   : > { %p2654_p6 = pnand %p2653_p12, %p2647_p7 }
  0x2a   : > { %2657 = shalt.err (!%p2654_p6)
}
  0x2b   : > { %s3752_s15 = smov 128   ;;  %s2860_s13 = smov 8  }
  0x2c   : > { %2433 = dma.hbm_to_vmem [thread:$0]  (!%p2981_p0), %s259_s16, 4096, %s261_s27, %s2993_s29, %s3752_s15, %s3752_s15, %s2860_s13  }
  0x2d   : > { %p3010_p12 = pnand %p2027_p1, %p291_p2  ;;  %s236_s28 = scalar_lea.hbm %s3739_s0, %s2977_s11 }
  0x2e   : > { %s228_s14 = scalar_lea.vmem [#allocation3], %s2974_s10  ;;  %s282_s7 = scalar_lea.hbm %s3741_s2, %s2977_s11 }
  0x2f   : > { %s237_s1 = sshll.u32 %s228_s14, 4  ;;  %s3767_s8 = sand.u32 1, %s2844_s20   ;;  %s238_s1 = int_to_ptr.vmem [resolvable:$true] %s237_s1 }
  0x30   : > { %s225_s18 = scalar_lea.sflag [#allocation4], %s3767_s8  ;;  %s2671_s16 = scalar_lea.vmem %s238_s1, 4096 }
  0x31   : > { %p2672_p6 = scmp.ne.s32.totalorder %s238_s1, %s2671_s16  ;;  %s2861_s27 = smov [#allocation3]  }
  0x32   : > { %s2676_s15 = sshll.u32 %s2861_s27, 4  ;;  %s2677_s15 = int_to_ptr.vmem [resolvable:$false] %s2676_s15 }
  0x33   : > { %p2674_p1 = pnand %p2672_p6, %p2632_p3  ;;  %s2678_s9 = scalar_lea.vmem %s2677_s15, 8192 }
  0x34   : > { %p2679_p4 = scmp.lt.s32.totalorder %s238_s1, %s2677_s15  ;;  %p2680_p5 = scmp.lt.s32.totalorder %s2678_s9, %s2671_s16 }
  0x35   : > { %p2675_p2 = pneg %p2674_p1 }
  0x36   : > { %p2681_p7 = por %p2680_p5, %p2679_p4 }
  0x38   : > { %p2682_p10 = pnand %p2681_p7, %p2675_p2 }
  0x3a   : > { %2685 = shalt.err (!%p2682_p10)
}
  0x3b   : > { %s3768_s22 = smov 128   ;;  %s274_s26 = scalar_lea.vmem [#allocation8], %s2974_s10 }
  0x3c   : > { %2430 = dma.hbm_to_vmem [thread:$0]  (!%p2981_p0), %s236_s28, 4096, %s238_s1, %s225_s18, %s3768_s22, %s3768_s22, %s2860_s13  }
  0x3d   : > { %s283_s8 = sshll.u32 %s274_s26, 4  ;;  %s2862_s15 = smov [#allocation8]   ;;  %s284_s8 = int_to_ptr.vmem [resolvable:$true] %s283_s8 }
  0x3e   : > { %s2699_s17 = scalar_lea.vmem %s284_s8, 4096  ;;  %s2704_s14 = sshll.u32 %s2862_s15, 4  ;;  %s2705_s14 = int_to_ptr.vmem [resolvable:$false] %s2704_s14 }
  0x3f   : > { %p2700_p13 = scmp.ne.s32.totalorder %s284_s8, %s2699_s17  ;;  %s2706_s16 = scalar_lea.vmem %s2705_s14, 8192 }
  0x40   : > { %p2707_p2 = scmp.lt.s32.totalorder %s284_s8, %s2705_s14  ;;  %p2708_p4 = scmp.lt.s32.totalorder %s2706_s16, %s2699_s17 }
  0x41   : > { %p2702_p6 = pnand %p2700_p13, %p2632_p3 }
  0x42   : > { %p2709_p5 = por %p2708_p4, %p2707_p2 }
  0x43   : > { %p2703_p1 = pneg %p2702_p6 }
  0x45   : > { %p2710_p7 = pnand %p2709_p5, %p2703_p1 }
  0x47   : > { %2713 = shalt.err (!%p2710_p7)
}
  0x48   : > { %2436 = dma.hbm_to_vmem [thread:$0]  (!%p2981_p0), %s282_s7, 4096, %s284_s8, %s2993_s29, %s3768_s22, %s3768_s22, %s2860_s13  }
  0x49   : > { %295 = sbr.rel (%p3010_p12) target bundleno = 1314 (0x522), region = 32  ;;  %s3051_s10 = sand.u32 (!%p3010_p12), 1, %s2840_s19  }
  0x4a   : > { %s2028_s12 = sshll.u32 (!%p3010_p12), %s3051_s10, 8  ;;  %s298_s28 = scalar_lea.sflag (!%p3010_p12), [#allocation4], %s3051_s10 }
  0x4b   : > { %s3055_s27 = scalar_lea.vmem (!%p3010_p12), [#allocation3], %s2028_s12 }
  0x4e   : > { %2815 = dma.done.wait (%p2950_p8), %s298_s28, 4096  }
  0x4f   : > { %2817 = vsyncadd (%p2950_p8), %s298_s28, 4294963200  ;;  %s306_s7 = sand.u32 1, %s2930_s24   ;;  %s3064_s29 = scalar_lea.vmem [#allocation6], %s2028_s12 }
  0x50   : > { %s307_s11 = scalar_lea.sflag [#allocation7], %s306_s7 }
  0x51   : > { %2819 = dma.done.wait (%p2950_p8), %s307_s11, 8192  }
  0x52   : > { %2821 = vsyncadd (%p2950_p8), %s307_s11, 4294959104  ;;  %s3070_s13 = scalar_lea.vmem [#allocation8], %s2028_s12  ;;  %s3072_s25 = scalar_lea.vmem [#allocation9], %s2028_s12 }
  0x53   : > { %s3074_s9 = scalar_lea.vmem [#allocation10], %s2028_s12  ;;  %p2033_p0 = scmp.ne.s32.totalorder %s2848_s21, 0 }
  0x55   : > { %374 = sbr.rel (%p2033_p0) target bundleno = 108 (0x6c), region = 48 }
  0x5a   : > { %vm407_vm0 = vcmask 0   ;;  %v2863_v0 = vmov 0.0  }
  0x5b   : > { %375 = vst [vmem:[#allocation2 + $0xb0] sm:$0xff] %v2863_v0  ;;  %376 = vst [vmem:[#allocation2] sm:$0xff] %v2863_v0 }
  0x5c   : > { %377 = vst [vmem:[#allocation2 + $0xd8] sm:$0xff] %v2863_v0  ;;  %378 = vst [vmem:[#allocation2 + $0x18] sm:$0xff] %v2863_v0 }
  0x5d   : > { %379 = vst [vmem:[#allocation2 + $0x50] sm:$0xff] %v2863_v0  ;;  %380 = vst [vmem:[#allocation2 + $0x68] sm:$0xff] %v2863_v0 }
  0x5e   : > { %381 = vst [vmem:[#allocation2 + $0x30] sm:$0xff] %v2863_v0  ;;  %382 = vst [vmem:[#allocation2 + $0x48] sm:$0xff] %v2863_v0 }
  0x5f   : > { %383 = vst [vmem:[#allocation2 + $0x80] sm:$0xff] %v2863_v0  ;;  %384 = vst [vmem:[#allocation2 + $0x88] sm:$0xff] %v2863_v0 }
  0x60   : > { %385 = vst [vmem:[#allocation2 + $0xe8] sm:$0xff] %v2863_v0  ;;  %386 = vst [vmem:[#allocation2 + $0xb8] sm:$0xff] %v2863_v0 }
  0x61   : > { %387 = vst [vmem:[#allocation2 + $0x60] sm:$0xff] %v2863_v0  ;;  %388 = vst [vmem:[#allocation2 + $0xf0] sm:$0xff] %v2863_v0 }
  0x62   : > { %389 = vst [vmem:[#allocation2 + $0x8] sm:$0xff] %v2863_v0  ;;  %390 = vst [vmem:[#allocation2 + $0x78] sm:$0xff] %v2863_v0 }
  0x63   : > { %391 = vst [vmem:[#allocation2 + $0x38] sm:$0xff] %v2863_v0  ;;  %392 = vst [vmem:[#allocation2 + $0x58] sm:$0xff] %v2863_v0 }
  0x64   : > { %393 = vst [vmem:[#allocation2 + $0x40] sm:$0xff] %v2863_v0  ;;  %394 = vst [vmem:[#allocation2 + $0xc8] sm:$0xff] %v2863_v0 }
  0x65   : > { %395 = vst [vmem:[#allocation2 + $0xe0] sm:$0xff] %v2863_v0  ;;  %396 = vst [vmem:[#allocation2 + $0x90] sm:$0xff] %v2863_v0 }
  0x66   : > { %397 = vst [vmem:[#allocation2 + $0x70] sm:$0xff] %v2863_v0  ;;  %398 = vst [vmem:[#allocation2 + $0xc0] sm:$0xff] %v2863_v0 }
  0x67   : > { %399 = vst [vmem:[#allocation2 + $0xa8] sm:$0xff] %v2863_v0  ;;  %400 = vst [vmem:[#allocation2 + $0xd0] sm:$0xff] %v2863_v0 }
  0x68   : > { %401 = vst [vmem:[#allocation2 + $0x10] sm:$0xff] %v2863_v0  ;;  %402 = vst [vmem:[#allocation2 + $0x28] sm:$0xff] %v2863_v0 }
  0x69   : > { %403 = vst [vmem:[#allocation2 + $0xa0] sm:$0xff] %v2863_v0  ;;  %404 = vst [vmem:[#allocation2 + $0xf8] sm:$0xff] %v2863_v0 }
  0x6a   : > { %405 = vst [vmem:[#allocation2 + $0x20] sm:$0xff] %v2863_v0  ;;  %406 = vst [vmem:[#allocation2 + $0x98] sm:$0xff] %v2863_v0 }
  0x6b   : > { %408 = vst.msk [vmem:[#allocation12] sm:$0x1] %vm407_vm0, %v2863_v0 }
  0x6c PF: > { %v456_v1 = vld [vmem:[%s3064_s29 + $0x78] sm:$0xff]  ;;  %v455_v3 = vld [vmem:[%s3064_s29 + $0x70] sm:$0xff]  ;;  %v454_v5 = vld [vmem:[%s3064_s29 + $0x68] sm:$0xff]  ;;  %vm1286_vm1 = vcmask 0   ;;  %p2034_p8 = scmp.ne.s32.totalorder %s2848_s21, 1 }
  0x6d   : > { %v472_v2 = vld [vmem:[%s3064_s29 + $0xf8] sm:$0xff]  ;;  %2185 = vmatprep.subr.mxu0 %v456_v1  ;;  %v471_v4 = vld [vmem:[%s3064_s29 + $0xf0] sm:$0xff]  ;;  %v470_v6 = vld [vmem:[%s3064_s29 + $0xe8] sm:$0xff] }
  0x6e   : > { %2241 = vmatprep.subr.mxu1 %v472_v2  ;;  %2186 = vmatpush3.xpose.msra.mxu0 %v456_v1  ;;  %v453_v7 = vld [vmem:[%s3064_s29 + $0x60] sm:$0xff]  ;;  %v452_v11 = vld [vmem:[%s3064_s29 + $0x58] sm:$0xff]  ;;  %v451_v13 = vld [vmem:[%s3064_s29 + $0x50] sm:$0xff] }
  0x6f   : > { %2242 = vmatpush3.xpose.msra.mxu1 %v472_v2  ;;  %2187 = vmatprep.subr.mxu0 %v455_v3  ;;  %v469_v8 = vld [vmem:[%s3064_s29 + $0xe0] sm:$0xff]  ;;  %v468_v12 = vld [vmem:[%s3064_s29 + $0xd8] sm:$0xff]  ;;  %v467_v14 = vld [vmem:[%s3064_s29 + $0xd0] sm:$0xff] }
  0x70   : > { %2243 = vmatprep.subr.mxu1 %v471_v4  ;;  %v409_v9 = vld [vmem:[%s3055_s27] sm:$0xff]  ;;  %v450_v15 = vld [vmem:[%s3064_s29 + $0x48] sm:$0xff]  ;;  %v448_v19 = vld [vmem:[%s3064_s29 + $0x38] sm:$0xff] }
  0x71   : > { %v425_v10 = vld [vmem:[%s3055_s27 + $0x80] sm:$0xff]  ;;  %2217 = vmatprep.mubr.f32.mxu0 %v409_v9  ;;  %v466_v16 = vld [vmem:[%s3064_s29 + $0xc8] sm:$0xff]  ;;  %v464_v20 = vld [vmem:[%s3064_s29 + $0xb8] sm:$0xff] }
  0x72   : > { %2188 = vmatpush3.xpose.msra.mxu0 %v455_v3  ;;  %2273 = vmatprep.mubr.f32.mxu1 %v425_v10  ;;  %v449_v17 = vld [vmem:[%s3064_s29 + $0x40] sm:$0xff]  ;;  %v447_v21 = vld [vmem:[%s3064_s29 + $0x30] sm:$0xff]  ;;  %v446_v23 = vld [vmem:[%s3064_s29 + $0x28] sm:$0xff] }
  0x73   : > { %2244 = vmatpush3.xpose.msra.mxu1 %v471_v4  ;;  %2189 = vmatprep.subr.mxu0 %v454_v5  ;;  %v465_v18 = vld [vmem:[%s3064_s29 + $0xc0] sm:$0xff]  ;;  %v463_v22 = vld [vmem:[%s3064_s29 + $0xb0] sm:$0xff]  ;;  %v462_v24 = vld [vmem:[%s3064_s29 + $0xa8] sm:$0xff] }
  0x74   : > { %2245 = vmatprep.subr.mxu1 %v470_v6  ;;  %v445_v25 = vld [vmem:[%s3064_s29 + $0x20] sm:$0xff]  ;;  %v444_v27 = vld [vmem:[%s3064_s29 + $0x18] sm:$0xff]  ;;  %v443_v29 = vld [vmem:[%s3064_s29 + $0x10] sm:$0xff] }
  0x75   : > { %v461_v26 = vld [vmem:[%s3064_s29 + $0xa0] sm:$0xff]  ;;  %v460_v28 = vld [vmem:[%s3064_s29 + $0x98] sm:$0xff]  ;;  %v459_v30 = vld [vmem:[%s3064_s29 + $0x90] sm:$0xff] }
  0x76   : > { %2190 = vmatpush3.xpose.msra.mxu0 %v454_v5  ;;  %v442_v31 = vld [vmem:[%s3064_s29 + $0x8] sm:$0xff]  ;;  %v441_v33 = vld [vmem:[%s3064_s29] sm:$0xff]  ;;  %v411_v37 = vld [vmem:[%s3055_s27 + $0x10] sm:$0xff] }
  0x77   : > { %2246 = vmatpush3.xpose.msra.mxu1 %v470_v6  ;;  %2191 = vmatprep.subr.mxu0 %v453_v7  ;;  %v458_v32 = vld [vmem:[%s3064_s29 + $0x88] sm:$0xff]  ;;  %v457_v34 = vld [vmem:[%s3064_s29 + $0x80] sm:$0xff]  ;;  %v427_v38 = vld [vmem:[%s3055_s27 + $0x90] sm:$0xff] }
  0x78   : > { %2247 = vmatprep.subr.mxu1 %v469_v8  ;;  %v410_v35 = vld [vmem:[%s3055_s27 + $0x8] sm:$0xff]  ;;  %v412_v39 = vld [vmem:[%s3055_s27 + $0x18] sm:$0xff]  ;;  %v413_v41 = vld [vmem:[%s3055_s27 + $0x20] sm:$0xff] }
  0x79   : > { %v426_v36 = vld [vmem:[%s3055_s27 + $0x88] sm:$0xff]  ;;  %v428_v40 = vld [vmem:[%s3055_s27 + $0x98] sm:$0xff]  ;;  %v429_v42 = vld [vmem:[%s3055_s27 + $0xa0] sm:$0xff] }
  0x7a   : > { %2192 = vmatpush3.xpose.msra.mxu0 %v453_v7  ;;  %v414_v43 = vld [vmem:[%s3055_s27 + $0x28] sm:$0xff]  ;;  %v415_v45 = vld [vmem:[%s3055_s27 + $0x30] sm:$0xff]  ;;  %v416_v47 = vld [vmem:[%s3055_s27 + $0x38] sm:$0xff] }
  0x7b   : > { %2248 = vmatpush3.xpose.msra.mxu1 %v469_v8  ;;  %2193 = vmatprep.subr.mxu0 %v452_v11  ;;  %v430_v44 = vld [vmem:[%s3055_s27 + $0xa8] sm:$0xff]  ;;  %v431_v46 = vld [vmem:[%s3055_s27 + $0xb0] sm:$0xff]  ;;  %v432_v48 = vld [vmem:[%s3055_s27 + $0xb8] sm:$0xff] }
  0x7c   : > { %2249 = vmatprep.subr.mxu1 %v468_v12  ;;  %v417_v49 = vld [vmem:[%s3055_s27 + $0x40] sm:$0xff]  ;;  %v418_v51 = vld [vmem:[%s3055_s27 + $0x48] sm:$0xff]  ;;  %v419_v53 = vld [vmem:[%s3055_s27 + $0x50] sm:$0xff] }
  0x7d   : > { %v433_v50 = vld [vmem:[%s3055_s27 + $0xc0] sm:$0xff]  ;;  %v434_v52 = vld [vmem:[%s3055_s27 + $0xc8] sm:$0xff]  ;;  %v435_v54 = vld [vmem:[%s3055_s27 + $0xd0] sm:$0xff] }
  0x7e   : > { %2194 = vmatpush3.xpose.msra.mxu0 %v452_v11  ;;  %v420_v55 = vld [vmem:[%s3055_s27 + $0x58] sm:$0xff]  ;;  %v421_v57 = vld [vmem:[%s3055_s27 + $0x60] sm:$0xff]  ;;  %v422_v59 = vld [vmem:[%s3055_s27 + $0x68] sm:$0xff] }
  0x7f   : > { %2250 = vmatpush3.xpose.msra.mxu1 %v468_v12  ;;  %2195 = vmatprep.subr.mxu0 %v451_v13  ;;  %v436_v56 = vld [vmem:[%s3055_s27 + $0xd8] sm:$0xff]  ;;  %v437_v58 = vld [vmem:[%s3055_s27 + $0xe0] sm:$0xff]  ;;  %v438_v60 = vld [vmem:[%s3055_s27 + $0xe8] sm:$0xff] }
  0x80   : > { %2251 = vmatprep.subr.mxu1 %v467_v14  ;;  %v423_v61 = vld [vmem:[%s3055_s27 + $0x70] sm:$0xff]  ;;  %v424_v63 = vld [vmem:[%s3055_s27 + $0x78] sm:$0xff] }
  0x81   : > { %v439_v62 = vld [vmem:[%s3055_s27 + $0xf0] sm:$0xff]  ;;  %v440_v0 = vld [vmem:[%s3055_s27 + $0xf8] sm:$0xff] }
  0x82   : > { %2196 = vmatpush3.xpose.msra.mxu0 %v451_v13 }
  0x83   : > { %2252 = vmatpush3.xpose.msra.mxu1 %v467_v14  ;;  %2197 = vmatprep.subr.mxu0 %v450_v15 }
  0x84   : > { %2253 = vmatprep.subr.mxu1 %v466_v16 }
  0x86   : > { %2198 = vmatpush3.xpose.msra.mxu0 %v450_v15 }
  0x87   : > { %2254 = vmatpush3.xpose.msra.mxu1 %v466_v16  ;;  %2199 = vmatprep.subr.mxu0 %v449_v17 }
  0x88   : > { %2255 = vmatprep.subr.mxu1 %v465_v18 }
  0x8a   : > { %2200 = vmatpush3.xpose.msra.mxu0 %v449_v17 }
  0x8b   : > { %2256 = vmatpush3.xpose.msra.mxu1 %v465_v18  ;;  %2201 = vmatprep.subr.mxu0 %v448_v19 }
  0x8c   : > { %2257 = vmatprep.subr.mxu1 %v464_v20 }
  0x8e   : > { %2202 = vmatpush3.xpose.msra.mxu0 %v448_v19 }
  0x8f   : > { %2258 = vmatpush3.xpose.msra.mxu1 %v464_v20  ;;  %2203 = vmatprep.subr.mxu0 %v447_v21 }
  0x90   : > { %2259 = vmatprep.subr.mxu1 %v463_v22 }
  0x92   : > { %2204 = vmatpush3.xpose.msra.mxu0 %v447_v21 }
  0x93   : > { %2260 = vmatpush3.xpose.msra.mxu1 %v463_v22  ;;  %2205 = vmatprep.subr.mxu0 %v446_v23 }
  0x94   : > { %2261 = vmatprep.subr.mxu1 %v462_v24 }
  0x96   : > { %2206 = vmatpush3.xpose.msra.mxu0 %v446_v23 }
  0x97   : > { %2262 = vmatpush3.xpose.msra.mxu1 %v462_v24  ;;  %2207 = vmatprep.subr.mxu0 %v445_v25 }
  0x98   : > { %2263 = vmatprep.subr.mxu1 %v461_v26 }
  0x9a   : > { %2208 = vmatpush3.xpose.msra.mxu0 %v445_v25 }
  0x9b   : > { %2264 = vmatpush3.xpose.msra.mxu1 %v461_v26  ;;  %2209 = vmatprep.subr.mxu0 %v444_v27 }
  0x9c   : > { %2265 = vmatprep.subr.mxu1 %v460_v28 }
  0x9e   : > { %2210 = vmatpush3.xpose.msra.mxu0 %v444_v27 }
  0x9f   : > { %2266 = vmatpush3.xpose.msra.mxu1 %v460_v28  ;;  %2211 = vmatprep.subr.mxu0 %v443_v29 }
  0xa0   : > { %2267 = vmatprep.subr.mxu1 %v459_v30 }
  0xa2   : > { %2212 = vmatpush3.xpose.msra.mxu0 %v443_v29 }
  0xa3   : > { %2268 = vmatpush3.xpose.msra.mxu1 %v459_v30  ;;  %2213 = vmatprep.subr.mxu0 %v442_v31 }
  0xa4   : > { %2269 = vmatprep.subr.mxu1 %v458_v32 }
  0xa6   : > { %2214 = vmatpush3.xpose.msra.mxu0 %v442_v31 }
  0xa7   : > { %2270 = vmatpush3.xpose.msra.mxu1 %v458_v32  ;;  %2215 = vmatprep.subr.mxu0 %v441_v33 }
  0xa8   : > { %2271 = vmatprep.subr.mxu1 %v457_v34 }
  0xaa   : > { %2216 = vmatpush3.xpose.msra.mxu0 %v441_v33 }
  0xab   : > { %2272 = vmatpush3.xpose.msra.mxu1 %v457_v34 }
  0xad   : > { %2218 = vmatmul.mubr.f32.vlgmr.msra.gmra.mxu0 %v410_v35 }
  0xae   : > { %2274 = vmatmul.mubr.f32.vlgmr.msra.gmra.mxu1 %v426_v36  ;;  %2220 = vmatprep.mubr.f32.mxu0 %v411_v37 }
  0xaf   : > { %2276 = vmatprep.mubr.f32.mxu1 %v427_v38 }
  0xb1   : > { %2221 = vmatmul.mubr.f32.gmra.mxu0 %v412_v39 }
  0xb2   : > { %2277 = vmatmul.mubr.f32.gmra.mxu1 %v428_v40  ;;  %2223 = vmatprep.mubr.f32.mxu0 %v413_v41 }
  0xb3   : > { %2279 = vmatprep.mubr.f32.mxu1 %v429_v42 }
  0xb5   : > { %2224 = vmatmul.mubr.f32.gmra.mxu0 %v414_v43 }
  0xb6   : > { %2280 = vmatmul.mubr.f32.gmra.mxu1 %v430_v44  ;;  %2226 = vmatprep.mubr.f32.mxu0 %v415_v45 }
  0xb7   : > { %2282 = vmatprep.mubr.f32.mxu1 %v431_v46 }
  0xb9   : > { %2227 = vmatmul.mubr.f32.gmra.mxu0 %v416_v47 }
  0xba   : > { %2283 = vmatmul.mubr.f32.gmra.mxu1 %v432_v48  ;;  %2229 = vmatprep.mubr.f32.mxu0 %v417_v49 }
  0xbb   : > { %2285 = vmatprep.mubr.f32.mxu1 %v433_v50 }
  0xbd   : > { %2230 = vmatmul.mubr.f32.gmra.mxu0 %v418_v51 }
  0xbe   : > { %2286 = vmatmul.mubr.f32.gmra.mxu1 %v434_v52  ;;  %2232 = vmatprep.mubr.f32.mxu0 %v419_v53 }
  0xbf   : > { %2288 = vmatprep.mubr.f32.mxu1 %v435_v54 }
  0xc1   : > { %2233 = vmatmul.mubr.f32.gmra.mxu0 %v420_v55 }
  0xc2   : > { %2289 = vmatmul.mubr.f32.gmra.mxu1 %v436_v56  ;;  %2235 = vmatprep.mubr.f32.mxu0 %v421_v57 }
  0xc3   : > { %2291 = vmatprep.mubr.f32.mxu1 %v437_v58 }
  0xc5   : > { %2236 = vmatmul.mubr.f32.gmra.mxu0 %v422_v59 }
  0xc6   : > { %2292 = vmatmul.mubr.f32.gmra.mxu1 %v438_v60  ;;  %2238 = vmatprep.mubr.f32.mxu0 %v423_v61 }
  0xc7   : > { %2294 = vmatprep.mubr.f32.mxu1 %v439_v62 }
  0xc9   : > { %2239 = vmatmul.mubr.f32.gmra.mxu0 %v424_v63 }
  0xca   : > { %2295 = vmatmul.mubr.f32.gmra.mxu1 %v440_v0 }
 0x16d   : > { %v2219_v1 = vpop.f32.mrf.mxu0 }
 0x16e   : > { %v2275_v2 = vpop.f32.mrf.mxu1  ;;  %v3142_v3 = vmul.f32 0.088388346, %v2219_v1  ;;  %v1335_v1 = vld [vmem:[%s3070_s13 + $0x78] sm:$0xff] }
 0x16f   : > { %v539_v4 = vpop.f32.mrf.mxu0  ;;  %v3146_v7 = vmul.f32 0.088388346, %v2275_v2  ;;  %v1334_v2 = vld [vmem:[%s3070_s13 + $0x70] sm:$0xff]  ;;  %2297 = vmatprep.subr.mxu0 %v1335_v1 }
 0x170   : > { %v684_v5 = vpop.f32.mrf.mxu1  ;;  %v3144_v6 = vmul.f32 0.088388346, %v539_v4  ;;  %797 = vmax.xlane.f32.xlu1 %v3142_v3  ;;  %v1351_v4 = vld [vmem:[%s3070_s13 + $0xf8] sm:$0xff]  ;;  %2298 = vmatpush3.msra.mxu0 %v1335_v1 }
 0x171   : > { %v3150_v9 = vmul.f32 0.088388346, %v684_v5  ;;  %v2222_v11 = vpop.f32.mrf.mxu0  ;;  %v1350_v5 = vld [vmem:[%s3070_s13 + $0xf0] sm:$0xff]  ;;  %2353 = vmatprep.subr.mxu1 %v1351_v4  ;;  %2299 = vmatprep.subr.mxu0 %v1334_v2 }
 0x172   : > { %v2278_v8 = vpop.f32.mrf.mxu1  ;;  %795 = vmax.xlane.f32.xlu0 %v3144_v6  ;;  %v3155_v13 = vmul.f32 0.088388346, %v2222_v11  ;;  %2354 = vmatpush3.msra.mxu1 %v1351_v4  ;;  %v1349_v11 = vld [vmem:[%s3070_s13 + $0xe8] sm:$0xff] }
 0x173   : > { %v3153_v10 = vmul.f32 0.088388346, %v2278_v8  ;;  %v549_v15 = vpop.f32.mrf.mxu0  ;;  %v1333_v8 = vld [vmem:[%s3070_s13 + $0x68] sm:$0xff]  ;;  %2300 = vmatpush3.msra.mxu0 %v1334_v2  ;;  %2355 = vmatprep.subr.mxu1 %v1350_v5 }
 0x174   : > { %829 = vmax.xlane.f32.xlu1 %v3146_v7  ;;  %v694_v12 = vpop.f32.mrf.mxu1  ;;  %v3162_v17 = vmul.f32 0.088388346, %v549_v15  ;;  %2301 = vmatprep.subr.mxu0 %v1333_v8  ;;  %v1348_v15 = vld [vmem:[%s3070_s13 + $0xe0] sm:$0xff] }
 0x175   : > { %v3159_v14 = vmul.f32 0.088388346, %v694_v12  ;;  %v2225_v19 = vpop.f32.mrf.mxu0  ;;  %v1332_v12 = vld [vmem:[%s3070_s13 + $0x60] sm:$0xff]  ;;  %2356 = vmatpush3.msra.mxu1 %v1350_v5  ;;  %2302 = vmatpush3.msra.mxu0 %v1333_v8 }
 0x176   : > { %827 = vmax.xlane.f32.xlu0 %v3150_v9  ;;  %v2281_v16 = vpop.f32.mrf.mxu1  ;;  %v3167_v21 = vmul.f32 0.088388346, %v2225_v19  ;;  %2357 = vmatprep.subr.mxu1 %v1349_v11  ;;  %v1330_v19 = vld [vmem:[%s3070_s13 + $0x50] sm:$0xff] }
 0x177   : > { %v3165_v18 = vmul.f32 0.088388346, %v2281_v16  ;;  %v559_v23 = vpop.f32.mrf.mxu0  ;;  %v1331_v16 = vld [vmem:[%s3070_s13 + $0x58] sm:$0xff]  ;;  %2303 = vmatprep.subr.mxu0 %v1332_v12  ;;  %2358 = vmatpush3.msra.mxu1 %v1349_v11 }
 0x178   : > { %833 = vmax.xlane.f32.xlu1 %v3153_v10  ;;  %v704_v20 = vpop.f32.mrf.mxu1  ;;  %v3174_v25 = vmul.f32 0.088388346, %v559_v23  ;;  %2304 = vmatpush3.msra.mxu0 %v1332_v12 }
 0x179   : > { %v3171_v22 = vmul.f32 0.088388346, %v704_v20  ;;  %v2228_v27 = vpop.f32.mrf.mxu0  ;;  %2359 = vmatprep.subr.mxu1 %v1348_v15  ;;  %2305 = vmatprep.subr.mxu0 %v1331_v16 }
 0x17a   : > { %801 = vmax.xlane.f32.xlu0 %v3155_v13  ;;  %v2284_v24 = vpop.f32.mrf.mxu1  ;;  %v3179_v29 = vmul.f32 0.088388346, %v2228_v27  ;;  %2360 = vmatpush3.msra.mxu1 %v1348_v15 }
 0x17b   : > { %v3177_v26 = vmul.f32 0.088388346, %v2284_v24  ;;  %v569_v31 = vpop.f32.mrf.mxu0  ;;  %2306 = vmatpush3.msra.mxu0 %v1331_v16 }
 0x17c   : > { %831 = vmax.xlane.f32.xlu1 %v3159_v14  ;;  %v714_v28 = vpop.f32.mrf.mxu1  ;;  %v3186_v33 = vmul.f32 0.088388346, %v569_v31  ;;  %2307 = vmatprep.subr.mxu0 %v1330_v19 }
 0x17d   : > { %v3183_v30 = vmul.f32 0.088388346, %v714_v28  ;;  %v2231_v35 = vpop.f32.mrf.mxu0  ;;  %2308 = vmatpush3.msra.mxu0 %v1330_v19 }
 0x17e   : > { %799 = vmax.xlane.f32.xlu0 %v3162_v17  ;;  %v2287_v32 = vpop.f32.mrf.mxu1  ;;  %v3191_v37 = vmul.f32 0.088388346, %v2231_v35 }
 0x17f   : > { %v3189_v34 = vmul.f32 0.088388346, %v2287_v32  ;;  %v579_v39 = vpop.f32.mrf.mxu0 }
 0x180   : > { %837 = vmax.xlane.f32.xlu1 %v3165_v18  ;;  %v724_v36 = vpop.f32.mrf.mxu1  ;;  %v3198_v41 = vmul.f32 0.088388346, %v579_v39 }
 0x181   : > { %v3195_v38 = vmul.f32 0.088388346, %v724_v36  ;;  %v2234_v43 = vpop.f32.mrf.mxu0 }
 0x182   : > { %805 = vmax.xlane.f32.xlu0 %v3167_v21  ;;  %v2290_v40 = vpop.f32.mrf.mxu1  ;;  %v3203_v45 = vmul.f32 0.088388346, %v2234_v43 }
 0x183   : > { %v3201_v42 = vmul.f32 0.088388346, %v2290_v40  ;;  %v589_v48 = vpop.f32.mrf.mxu0 }
 0x184   : > { %835 = vmax.xlane.f32.xlu1 %v3171_v22  ;;  %v734_v44 = vpop.f32.mrf.mxu1  ;;  %v3210_v51 = vmul.f32 0.088388346, %v589_v48 }
 0x185   : > { %v3207_v47 = vmul.f32 0.088388346, %v734_v44  ;;  %v2237_v50 = vpop.f32.mrf.mxu0 }
 0x186   : > { %803 = vmax.xlane.f32.xlu0 %v3174_v25  ;;  %v2293_v46 = vpop.f32.mrf.mxu1  ;;  %v3215_v54 = vmul.f32 0.088388346, %v2237_v50 }
 0x187   : > { %v3213_v52 = vmul.f32 0.088388346, %v2293_v46  ;;  %v599_v55 = vpop.f32.mrf.mxu0 }
 0x188   : > { %841 = vmax.xlane.f32.xlu1 %v3177_v26  ;;  %v744_v49 = vpop.f32.mrf.mxu1  ;;  %v3222_v59 = vmul.f32 0.088388346, %v599_v55 }
 0x189   : > { %v3219_v56 = vmul.f32 0.088388346, %v744_v49  ;;  %v2240_v57 = vpop.f32.mrf.mxu0 }
 0x18a   : > { %809 = vmax.xlane.f32.xlu0 %v3179_v29  ;;  %v2296_v53 = vpop.f32.mrf.mxu1  ;;  %v3234_v0 = vmul.f32 0.088388346, %v2240_v57 }
 0x18b   : > { %v609_v61 = vpop.f32.mrf.mxu0  ;;  %v3228_v62 = vmul.f32 0.088388346, %v2296_v53 }
 0x18c   : > { %839 = vmax.xlane.f32.xlu1 %v3183_v30  ;;  %v754_v58 = vpop.f32.mrf.mxu1  ;;  %v3230_v63 = vmul.f32 0.088388346, %v609_v61 }
 0x18d   : > { %v3225_v60 = vmul.f32 0.088388346, %v754_v58 }
 0x18e   : > { %807 = vmax.xlane.f32.xlu0 %v3186_v33 }
 0x190   : > { %845 = vmax.xlane.f32.xlu1 %v3189_v34 }
 0x192   : > { %813 = vmax.xlane.f32.xlu0 %v3191_v37 }
 0x194   : > { %843 = vmax.xlane.f32.xlu1 %v3195_v38 }
 0x196   : > { %811 = vmax.xlane.f32.xlu0 %v3198_v41 }
 0x198   : > { %849 = vmax.xlane.f32.xlu1 %v3201_v42 }
 0x19a   : > { %817 = vmax.xlane.f32.xlu0 %v3203_v45 }
 0x19c   : > { %847 = vmax.xlane.f32.xlu1 %v3207_v47 }
 0x19e   : > { %815 = vmax.xlane.f32.xlu0 %v3210_v51 }
 0x1a0   : > { %853 = vmax.xlane.f32.xlu1 %v3213_v52 }
 0x1a2   : > { %821 = vmax.xlane.f32.xlu0 %v3215_v54 }
 0x1a4   : > { %851 = vmax.xlane.f32.xlu1 %v3219_v56 }
 0x1a6   : > { %819 = vmax.xlane.f32.xlu0 %v3222_v59 }
 0x1a8   : > { %855 = vmax.xlane.f32.xlu1 %v3225_v60 }
 0x1aa   : > { %823 = vmax.xlane.f32.xlu0 %v3230_v63 }
 0x1ac   : > { %857 = vmax.xlane.f32.xlu1 %v3228_v62 }
 0x1ae   : > { %825 = vmax.xlane.f32.xlu0 %v3234_v0 }
 0x1f9   : > { %v798_v20 = vpop.xlane.xlu1 %797 }
 0x1fa   : > { %v860_v23 = vsub.f32 %v3142_v3, %v798_v20 }
 0x1fb   : > { %v796_v24 = vpop.xlane.xlu0 %795 }
 0x1fc   : > { %v893_v27 = vmul.f32 1.442695, %v860_v23  ;;  %v859_v28 = vsub.f32 %v3144_v6, %v796_v24 }
 0x1fd   : > { %v830_v31 = vpop.xlane.xlu1 %829 }
 0x1fe   : > { %2502 = vpow2.f32 %v893_v27  ;;  %v891_v32 = vmul.f32 1.442695, %v859_v28  ;;  %v876_v35 = vsub.f32 %v3146_v7, %v830_v31  ;;  %v1347_v31 = vld [vmem:[%s3070_s13 + $0xd8] sm:$0xff] }
 0x1ff   : > { %v828_v36 = vpop.xlane.xlu0 %827  ;;  %2361 = vmatprep.subr.mxu1 %v1347_v31 }
 0x200   : > { %v925_v39 = vmul.f32 1.442695, %v876_v35  ;;  %v875_v40 = vsub.f32 %v3150_v9, %v828_v36  ;;  %2504 = vpow2.f32 %v891_v32  ;;  %v1328_v32 = vld [vmem:[%s3070_s13 + $0x40] sm:$0xff]  ;;  %2362 = vmatpush3.msra.mxu1 %v1347_v31 }
 0x201   : > { %v834_v43 = vpop.xlane.xlu1 %833 }
 0x202   : > { %2506 = vpow2.f32 %v925_v39  ;;  %v923_v44 = vmul.f32 1.442695, %v875_v40  ;;  %v878_v46 = vsub.f32 %v3153_v10, %v834_v43 }
 0x203   : > { %v802_v3 = vpop.xlane.xlu0 %801 }
 0x204   : > { %v862_v48 = vsub.f32 %v3155_v13, %v802_v3  ;;  %2508 = vpow2.f32 %v923_v44  ;;  %v929_v6 = vmul.f32 1.442695, %v878_v46 }
 0x205   : > { %v832_v49 = vpop.xlane.xlu1 %831 }
 0x206   : > { %v897_v50 = vmul.f32 1.442695, %v862_v48  ;;  %v877_v53 = vsub.f32 %v3159_v14, %v832_v49  ;;  %v1327_v48 = vld [vmem:[%s3070_s13 + $0x38] sm:$0xff]  ;;  %v1345_v49 = vld [vmem:[%s3070_s13 + $0xc8] sm:$0xff] }
 0x207   : > { %v800_v7 = vpop.xlane.xlu0 %799 }
 0x208   : > { %2510 = vpow2.f32 %v897_v50  ;;  %v861_v55 = vsub.f32 %v3162_v17, %v800_v7  ;;  %v927_v57 = vmul.f32 1.442695, %v877_v53  ;;  %v1326_v50 = vld [vmem:[%s3070_s13 + $0x30] sm:$0xff]  ;;  %v1344_v53 = vld [vmem:[%s3070_s13 + $0xc0] sm:$0xff] }
 0x209   : > { %v838_v9 = vpop.xlane.xlu1 %837  ;;  %2512 = vpow2.f32 %v929_v6 }
 0x20a   : > { %v895_v58 = vmul.f32 1.442695, %v861_v55  ;;  %v880_v61 = vsub.f32 %v3165_v18, %v838_v9 }
 0x20b   : > { %v3257_v10 = vpop.eup %2502  ;;  %v806_v1 = vpop.xlane.xlu0 %805 }
 0x20c   : > { %2514 = vpow2.f32 %v895_v58  ;;  %v864_v13 = vsub.f32 %v3167_v21, %v806_v1  ;;  %957 = vadd.xlane.f32.xlu0 %v3257_v10  ;;  %v933_v4 = vmul.f32 1.442695, %v880_v61  ;;  %v1343_v1 = vld [vmem:[%s3070_s13 + $0xb8] sm:$0xff] }
 0x20d   : > { %v836_v2 = vpop.xlane.xlu1 %835  ;;  %v3261_v14 = vpop.eup %2504  ;;  %2516 = vpow2.f32 %v927_v57 }
 0x20e   : > { %v901_v17 = vmul.f32 1.442695, %v864_v13  ;;  %v879_v5 = vsub.f32 %v3171_v22, %v836_v2 }
 0x20f   : > { %v3264_v8 = vpop.eup %2506  ;;  %v804_v11 = vpop.xlane.xlu0 %803 }
 0x210   : > { %2518 = vpow2.f32 %v901_v17  ;;  %v863_v18 = vsub.f32 %v3174_v25, %v804_v11  ;;  %989 = vadd.xlane.f32.xlu1 %v3264_v8  ;;  %955 = vadd.xlane.f32.xlu0 %v3261_v14  ;;  %v931_v12 = vmul.f32 1.442695, %v879_v5 }
 0x211   : > { %v842_v21 = vpop.xlane.xlu1 %841  ;;  %2520 = vpow2.f32 %v933_v4  ;;  %v3270_v22 = vpop.eup %2508  ;;  %v1324_v4 = vld [vmem:[%s3070_s13 + $0x20] sm:$0xff] }
 0x212   : > { %v899_v15 = vmul.f32 1.442695, %v863_v18  ;;  %v882_v16 = vsub.f32 %v3177_v26, %v842_v21  ;;  %v1329_v26 = vld [vmem:[%s3070_s13 + $0x48] sm:$0xff] }
 0x213   : > { %v810_v19 = vpop.xlane.xlu0 %809  ;;  %2309 = vmatprep.subr.mxu0 %v1329_v26 }
 0x214   : > { %2522 = vpow2.f32 %v899_v15  ;;  %v866_v20 = vsub.f32 %v3179_v29, %v810_v19  ;;  %987 = vadd.xlane.f32.xlu1 %v3270_v22  ;;  %v937_v23 = vmul.f32 1.442695, %v882_v16  ;;  %v1346_v29 = vld [vmem:[%s3070_s13 + $0xd0] sm:$0xff]  ;;  %2310 = vmatpush3.msra.mxu0 %v1329_v26  ;;  %v1323_v15 = vld [vmem:[%s3070_s13 + $0x18] sm:$0xff]  ;;  %v1341_v16 = vld [vmem:[%s3070_s13 + $0xa8] sm:$0xff] }
 0x215   : > { %v3274_v25 = vpop.eup %2510  ;;  %v840_v24 = vpop.xlane.xlu1 %839  ;;  %2524 = vpow2.f32 %v931_v12  ;;  %2311 = vmatprep.subr.mxu0 %v1328_v32  ;;  %2363 = vmatprep.subr.mxu1 %v1346_v29  ;;  %v1340_v26 = vld [vmem:[%s3070_s13 + $0xa0] sm:$0xff] }
 0x216   : > { %v905_v27 = vmul.f32 1.442695, %v866_v20  ;;  %v881_v28 = vsub.f32 %v3183_v30, %v840_v24  ;;  %961 = vadd.xlane.f32.xlu0 %v3274_v25  ;;  %v3281_v35 = vpop.eup %2512  ;;  %2312 = vmatpush3.msra.mxu0 %v1328_v32 }
 0x217   : > { %v808_v36 = vpop.xlane.xlu0 %807  ;;  %2364 = vmatpush3.msra.mxu1 %v1346_v29  ;;  %2313 = vmatprep.subr.mxu0 %v1327_v48 }
 0x218   : > { %2526 = vpow2.f32 %v905_v27  ;;  %v865_v39 = vsub.f32 %v3186_v33, %v808_v36  ;;  %993 = vadd.xlane.f32.xlu1 %v3281_v35  ;;  %v935_v43 = vmul.f32 1.442695, %v881_v28  ;;  %2365 = vmatprep.subr.mxu1 %v1345_v49  ;;  %v1321_v36 = vld [vmem:[%s3070_s13 + $0x8] sm:$0xff] }
 0x219   : > { %v3286_v30 = vpop.eup %2514  ;;  %v846_v40 = vpop.xlane.xlu1 %845  ;;  %2528 = vpow2.f32 %v937_v23  ;;  %2314 = vmatpush3.msra.mxu0 %v1327_v48  ;;  %2366 = vmatpush3.msra.mxu1 %v1345_v49  ;;  %v1338_v48 = vld [vmem:[%s3070_s13 + $0x90] sm:$0xff] }
 0x21a   : > { %v903_v44 = vmul.f32 1.442695, %v865_v39  ;;  %v884_v46 = vsub.f32 %v3189_v34, %v846_v40  ;;  %959 = vadd.xlane.f32.xlu0 %v3286_v30  ;;  %v3290_v33 = vpop.eup %2516  ;;  %2315 = vmatprep.subr.mxu0 %v1326_v50 }
 0x21b   : > { %v814_v3 = vpop.xlane.xlu0 %813  ;;  %2367 = vmatprep.subr.mxu1 %v1344_v53  ;;  %2316 = vmatpush3.msra.mxu0 %v1326_v50 }
 0x21c   : > { %2530 = vpow2.f32 %v903_v44  ;;  %v868_v6 = vsub.f32 %v3191_v37, %v814_v3  ;;  %991 = vadd.xlane.f32.xlu1 %v3290_v33  ;;  %v941_v55 = vmul.f32 1.442695, %v884_v46  ;;  %v1325_v37 = vld [vmem:[%s3070_s13 + $0x28] sm:$0xff]  ;;  %2368 = vmatpush3.msra.mxu1 %v1344_v53  ;;  %v1320_v3 = vld [vmem:[%s3070_s13] sm:$0xff] }
 0x21d   : > { %v3298_v34 = vpop.eup %2518  ;;  %v844_v7 = vpop.xlane.xlu1 %843  ;;  %2532 = vpow2.f32 %v935_v43  ;;  %2317 = vmatprep.subr.mxu0 %v1325_v37  ;;  %2369 = vmatprep.subr.mxu1 %v1343_v1 }
 0x21e   : > { %v909_v9 = vmul.f32 1.442695, %v868_v6  ;;  %v883_v57 = vsub.f32 %v3195_v38, %v844_v7  ;;  %965 = vadd.xlane.f32.xlu0 %v3298_v34  ;;  %v3303_v58 = vpop.eup %2520  ;;  %2318 = vmatpush3.msra.mxu0 %v1325_v37 }
 0x21f   : > { %v812_v61 = vpop.xlane.xlu0 %811  ;;  %2370 = vmatpush3.msra.mxu1 %v1343_v1  ;;  %2319 = vmatprep.subr.mxu0 %v1324_v4 }
 0x220   : > { %2534 = vpow2.f32 %v909_v9  ;;  %v867_v13 = vsub.f32 %v3198_v41, %v812_v61  ;;  %997 = vadd.xlane.f32.xlu1 %v3303_v58  ;;  %v939_v17 = vmul.f32 1.442695, %v883_v57  ;;  %v1342_v41 = vld [vmem:[%s3070_s13 + $0xb0] sm:$0xff]  ;;  %2320 = vmatpush3.msra.mxu0 %v1324_v4 }
 0x221   : > { %v3308_v2 = vpop.eup %2522  ;;  %v850_v38 = vpop.xlane.xlu1 %849  ;;  %2536 = vpow2.f32 %v941_v55  ;;  %2371 = vmatprep.subr.mxu1 %v1342_v41  ;;  %2321 = vmatprep.subr.mxu0 %v1323_v15  ;;  %v1337_v55 = vld [vmem:[%s3070_s13 + $0x88] sm:$0xff] }
 0x222   : > { %v907_v5 = vmul.f32 1.442695, %v867_v13  ;;  %v886_v11 = vsub.f32 %v3201_v42, %v850_v38  ;;  %963 = vadd.xlane.f32.xlu0 %v3308_v2  ;;  %v3314_v18 = vpop.eup %2524  ;;  %2372 = vmatpush3.msra.mxu1 %v1342_v41 }
 0x223   : > { %v818_v21 = vpop.xlane.xlu0 %817  ;;  %2373 = vmatprep.subr.mxu1 %v1341_v16  ;;  %2322 = vmatpush3.msra.mxu0 %v1323_v15 }
 0x224   : > { %2538 = vpow2.f32 %v907_v5  ;;  %v870_v12 = vsub.f32 %v3203_v45, %v818_v21  ;;  %995 = vadd.xlane.f32.xlu1 %v3314_v18  ;;  %v945_v20 = vmul.f32 1.442695, %v886_v11  ;;  %v1322_v45 = vld [vmem:[%s3070_s13 + $0x10] sm:$0xff]  ;;  %2374 = vmatpush3.msra.mxu1 %v1341_v16 }
 0x225   : > { %v3320_v42 = vpop.eup %2526  ;;  %v848_v19 = vpop.xlane.xlu1 %847  ;;  %2540 = vpow2.f32 %v939_v17  ;;  %2323 = vmatprep.subr.mxu0 %v1322_v45  ;;  %2375 = vmatprep.subr.mxu1 %v1340_v26 }
 0x226   : > { %v913_v23 = vmul.f32 1.442695, %v870_v12  ;;  %v885_v24 = vsub.f32 %v3207_v47, %v848_v19  ;;  %969 = vadd.xlane.f32.xlu0 %v3320_v42  ;;  %v3325_v27 = vpop.eup %2528  ;;  %2324 = vmatpush3.msra.mxu0 %v1322_v45 }
 0x227   : > { %v816_v28 = vpop.xlane.xlu0 %815  ;;  %2376 = vmatpush3.msra.mxu1 %v1340_v26  ;;  %2325 = vmatprep.subr.mxu0 %v1321_v36 }
 0x228   : > { %2542 = vpow2.f32 %v913_v23  ;;  %v869_v31 = vsub.f32 %v3210_v51, %v816_v28  ;;  %1001 = vadd.xlane.f32.xlu1 %v3325_v27  ;;  %v943_v29 = vmul.f32 1.442695, %v885_v24  ;;  %v1339_v51 = vld [vmem:[%s3070_s13 + $0x98] sm:$0xff]  ;;  %2326 = vmatpush3.msra.mxu0 %v1321_v36 }
 0x229   : > { %v3330_v32 = vpop.eup %2530  ;;  %v854_v47 = vpop.xlane.xlu1 %853  ;;  %2544 = vpow2.f32 %v945_v20  ;;  %2377 = vmatprep.subr.mxu1 %v1339_v51  ;;  %2327 = vmatprep.subr.mxu0 %v1320_v3 }
 0x22a   : > { %v911_v39 = vmul.f32 1.442695, %v869_v31  ;;  %v888_v40 = vsub.f32 %v3213_v52, %v854_v47  ;;  %967 = vadd.xlane.f32.xlu0 %v3330_v32  ;;  %v3336_v43 = vpop.eup %2532  ;;  %2378 = vmatpush3.msra.mxu1 %v1339_v51 }
 0x22b   : > { %v822_v44 = vpop.xlane.xlu0 %821  ;;  %2379 = vmatprep.subr.mxu1 %v1338_v48  ;;  %2328 = vmatpush3.msra.mxu0 %v1320_v3 }
 0x22c   : > { %2546 = vpow2.f32 %v911_v39  ;;  %v872_v46 = vsub.f32 %v3215_v54, %v822_v44  ;;  %999 = vadd.xlane.f32.xlu1 %v3336_v43  ;;  %v949_v6 = vmul.f32 1.442695, %v888_v40  ;;  %2380 = vmatpush3.msra.mxu1 %v1338_v48 }
 0x22d   : > { %v3342_v49 = vpop.eup %2534  ;;  %v852_v52 = vpop.xlane.xlu1 %851  ;;  %2548 = vpow2.f32 %v943_v29  ;;  %2381 = vmatprep.subr.mxu1 %v1337_v55 }
 0x22e   : > { %v917_v50 = vmul.f32 1.442695, %v872_v46  ;;  %v887_v53 = vsub.f32 %v3219_v56, %v852_v52  ;;  %973 = vadd.xlane.f32.xlu0 %v3342_v49  ;;  %v3346_v54 = vpop.eup %2536  ;;  %v1336_v56 = vld [vmem:[%s3070_s13 + $0x80] sm:$0xff]  ;;  %2382 = vmatpush3.msra.mxu1 %v1337_v55 }
 0x22f   : > { %v820_v7 = vpop.xlane.xlu0 %819  ;;  %2383 = vmatprep.subr.mxu1 %v1336_v56  ;;  %v1084_v52 = vld [vmem:[#allocation2] sm:$0xff] }
 0x230   : > { %2550 = vpow2.f32 %v917_v50  ;;  %v871_v9 = vsub.f32 %v3222_v59, %v820_v7  ;;  %1005 = vadd.xlane.f32.xlu1 %v3346_v54  ;;  %v947_v61 = vmul.f32 1.442695, %v887_v53  ;;  %2384 = vmatpush3.msra.mxu1 %v1336_v56  ;;  %v1100_v56 = vld [vmem:[#allocation2 + $0x58] sm:$0xff] }
 0x231   : > { %v3351_v57 = vpop.eup %2538  ;;  %v856_v37 = vpop.xlane.xlu1 %855  ;;  %2552 = vpow2.f32 %v949_v6 }
 0x232   : > { %v915_v1 = vmul.f32 1.442695, %v871_v9  ;;  %v889_v13 = vsub.f32 %v3225_v60, %v856_v37  ;;  %971 = vadd.xlane.f32.xlu0 %v3351_v57  ;;  %v3356_v38 = vpop.eup %2540 }
 0x233   : > { %v824_v4 = vpop.xlane.xlu0 %823 }
 0x234   : > { %2554 = vpow2.f32 %v915_v1  ;;  %v873_v59 = vsub.f32 %v3230_v63, %v824_v4  ;;  %1003 = vadd.xlane.f32.xlu1 %v3356_v38  ;;  %v951_v11 = vmul.f32 1.442695, %v889_v13 }
 0x235   : > { %v3360_v17 = vpop.eup %2542  ;;  %v858_v5 = vpop.xlane.xlu1 %857  ;;  %2556 = vpow2.f32 %v947_v61  ;;  %v1083_v61 = vld [vmem:[#allocation2 + $0xb0] sm:$0xff] }
 0x236   : > { %v919_v60 = vmul.f32 1.442695, %v873_v59  ;;  %v890_v41 = vsub.f32 %v3228_v62, %v858_v5  ;;  %977 = vadd.xlane.f32.xlu0 %v3360_v17  ;;  %v3364_v21 = vpop.eup %2544 }
 0x237   : > { %v826_v12 = vpop.xlane.xlu0 %825 }
 0x238   : > { %2558 = vpow2.f32 %v919_v60  ;;  %v874_v63 = vsub.f32 %v3234_v0, %v826_v12  ;;  %1009 = vadd.xlane.f32.xlu1 %v3364_v21  ;;  %v953_v16 = vmul.f32 1.442695, %v890_v41  ;;  %v1099_v41 = vld [vmem:[#allocation2 + $0x38] sm:$0xff] }
 0x239   : > { %v3368_v15 = vpop.eup %2546  ;;  %2560 = vpow2.f32 %v951_v11 }
 0x23a   : > { %v921_v19 = vmul.f32 1.442695, %v874_v63  ;;  %975 = vadd.xlane.f32.xlu0 %v3368_v15  ;;  %v3371_v20 = vpop.eup %2548 }
 0x23c   : > { %2562 = vpow2.f32 %v921_v19  ;;  %1007 = vadd.xlane.f32.xlu1 %v3371_v20  ;;  %v1086_v19 = vld [vmem:[#allocation2 + $0x18] sm:$0xff] }
 0x23d   : > { %v3374_v62 = vpop.eup %2550  ;;  %2564 = vpow2.f32 %v953_v16 }
 0x23e   : > { %981 = vadd.xlane.f32.xlu0 %v3374_v62  ;;  %v3377_v0 = vpop.eup %2552 }
 0x240   : > { %1013 = vadd.xlane.f32.xlu1 %v3377_v0 }
 0x241   : > { %v3380_v23 = vpop.eup %2554 }
 0x242   : > { %979 = vadd.xlane.f32.xlu0 %v3380_v23  ;;  %v3383_v24 = vpop.eup %2556 }
 0x244   : > { %1011 = vadd.xlane.f32.xlu1 %v3383_v24 }
 0x245   : > { %v3386_v45 = vpop.eup %2558 }
 0x246   : > { %983 = vadd.xlane.f32.xlu0 %v3386_v45  ;;  %v3389_v28 = vpop.eup %2560 }
 0x248   : > { %1015 = vadd.xlane.f32.xlu1 %v3389_v28 }
 0x249   : > { %v3392_v26 = vpop.eup %2562 }
 0x24a   : > { %985 = vadd.xlane.f32.xlu0 %v3392_v26  ;;  %v3395_v31 = vpop.eup %2564 }
 0x24c   : > { %1017 = vadd.xlane.f32.xlu1 %v3395_v31 }
 0x295   : > { %v958_v47 = vpop.xlane.xlu0 %957 }
 0x296   : > { %2566 = vrcp.f32 %v958_v47 }
 0x299   : > { %v990_v36 = vpop.xlane.xlu1 %989  ;;  %v956_v29 = vpop.xlane.xlu0 %955 }
 0x29a   : > { %2568 = vrcp.f32 %v990_v36 }
 0x29b   : > { %2570 = vrcp.f32 %v956_v29 }
 0x29d   : > { %v988_v39 = vpop.xlane.xlu1 %987 }
 0x29e   : > { %2572 = vrcp.f32 %v988_v39 }
 0x29f   : > { %v962_v40 = vpop.xlane.xlu0 %961 }
 0x2a0   : > { %2574 = vrcp.f32 %v962_v40 }
 0x2a1   : > { %v994_v51 = vpop.xlane.xlu1 %993 }
 0x2a2   : > { %2576 = vrcp.f32 %v994_v51 }
 0x2a3   : > { %v2567_v44 = vpop.eup %2566  ;;  %v960_v46 = vpop.xlane.xlu0 %959 }
 0x2a4   : > { %2578 = vrcp.f32 %v960_v46  ;;  %v3399_v3 = vmul.f32 %v2567_v44, %v3257_v10  ;;  %v1102_v44 = vld [vmem:[#allocation2 + $0xc8] sm:$0xff] }
 0x2a5   : > { %v992_v48 = vpop.xlane.xlu1 %991 }
 0x2a6   : > { %2580 = vrcp.f32 %v992_v48  ;;  %v1116_v6 = vand.u32 2147483647, %v3399_v3  ;;  %1289 = vst [vmem:[%s3074_s9 + $0x8] sm:$0xff] %v3399_v3 }
 0x2a7   : > { %v2569_v50 = vpop.eup %2568  ;;  %v966_v53 = vpop.xlane.xlu0 %965 }
 0x2a8   : > { %v2571_v7 = vpop.eup %2570  ;;  %2582 = vrcp.f32 %v966_v53  ;;  %v1148_v55 = vadd.f32 %v1116_v6, %v1084_v52  ;;  %v3405_v9 = vmul.f32 %v2569_v50, %v3264_v8  ;;  %v1085_v52 = vld [vmem:[#allocation2 + $0xd8] sm:$0xff] }
 0x2a9   : > { %v998_v37 = vpop.xlane.xlu1 %997  ;;  %v3408_v10 = vmul.f32 %v2571_v7, %v3261_v14  ;;  %v1101_v7 = vld [vmem:[#allocation2 + $0x40] sm:$0xff] }
 0x2aa   : > { %2584 = vrcp.f32 %v998_v37  ;;  %1180 = vst [vmem:[#allocation2] sm:$0xff] %v1148_v55  ;;  %v1132_v1 = vand.u32 2147483647, %v3405_v9  ;;  %1305 = vst [vmem:[%s3074_s9 + $0x88] sm:$0xff] %v3405_v9 }
 0x2ab   : > { %v2573_v13 = vpop.eup %2572  ;;  %v1115_v4 = vand.u32 2147483647, %v3408_v10  ;;  %1288 = vst [vmem:[%s3074_s9] sm:$0xff] %v3408_v10  ;;  %2329 = vmatprep.mubr.f32.mxu0 %v3408_v10  ;;  %v964_v8 = vpop.xlane.xlu0 %963 }
 0x2ac   : > { %2330 = vmatmul.mubr.f32.vlgmr.msra.gmra.mxu0 %v3399_v3  ;;  %2586 = vrcp.f32 %v964_v8  ;;  %v3419_v14 = vmul.f32 %v2573_v13, %v3270_v22  ;;  %v1164_v59 = vadd.f32 %v1132_v1, %v1100_v56 }
 0x2ad   : > { %v2575_v5 = vpop.eup %2574  ;;  %v1147_v11 = vadd.f32 %v1115_v4, %v1083_v61  ;;  %v996_v60 = vpop.xlane.xlu1 %995  ;;  %v1088_v4 = vld [vmem:[#allocation2 + $0x68] sm:$0xff] }
 0x2ae   : > { %2588 = vrcp.f32 %v996_v60  ;;  %v1131_v12 = vand.u32 2147483647, %v3419_v14  ;;  %1304 = vst [vmem:[%s3074_s9 + $0x80] sm:$0xff] %v3419_v14  ;;  %2385 = vmatprep.mubr.f32.mxu1 %v3419_v14  ;;  %1196 = vst [vmem:[#allocation2 + $0x58] sm:$0xff] %v1164_v59  ;;  %v3426_v63 = vmul.f32 %v2575_v5, %v3274_v25  ;;  %v1212_v5 = vmul.f32 %v3408_v10, %v3408_v10 }
 0x2af   : > { %v2577_v16 = vpop.eup %2576  ;;  %1179 = vst [vmem:[#allocation2 + $0xb0] sm:$0xff] %v1147_v11  ;;  %2386 = vmatmul.mubr.f32.vlgmr.msra.gmra.mxu1 %v3405_v9  ;;  %v970_v22 = vpop.xlane.xlu0 %969 }
 0x2b0   : > { %v1163_v47 = vadd.f32 %v1131_v12, %v1099_v41  ;;  %2590 = vrcp.f32 %v970_v22  ;;  %v1118_v36 = vand.u32 2147483647, %v3426_v63  ;;  %1291 = vst [vmem:[%s3074_s9 + $0x18] sm:$0xff] %v3426_v63  ;;  %v3433_v40 = vmul.f32 %v2577_v16, %v3281_v35  ;;  %v1104_v41 = vld [vmem:[#allocation2 + $0x90] sm:$0xff] }
 0x2b1   : > { %v2579_v29 = vpop.eup %2578  ;;  %v1002_v39 = vpop.xlane.xlu1 %1001  ;;  %v1213_v16 = vmul.f32 %v3399_v3, %v3399_v3 }
 0x2b2   : > { %1195 = vst [vmem:[#allocation2 + $0x38] sm:$0xff] %v1163_v47  ;;  %2592 = vrcp.f32 %v1002_v39  ;;  %v1024_v25 = vmul.f32 %v2579_v29, %v3286_v30  ;;  %v1150_v51 = vadd.f32 %v1118_v36, %v1086_v19  ;;  %v1134_v6 = vand.u32 2147483647, %v3433_v40  ;;  %1307 = vst [vmem:[%s3074_s9 + $0x98] sm:$0xff] %v3433_v40  ;;  %v1087_v19 = vld [vmem:[#allocation2 + $0x50] sm:$0xff] }
 0x2b3   : > { %v2581_v46 = vpop.eup %2580  ;;  %v968_v48 = vpop.xlane.xlu0 %967  ;;  %v1244_v39 = vadd.f32 %v1213_v16, %v1212_v5 }
 0x2b4   : > { %2594 = vrcp.f32 %v968_v48  ;;  %v1117_v50 = vand.u32 2147483647, %v1024_v25  ;;  %1290 = vst [vmem:[%s3074_s9 + $0x10] sm:$0xff] %v1024_v25  ;;  %2332 = vmatprep.mubr.f32.mxu0 %v1024_v25  ;;  %1182 = vst [vmem:[#allocation2 + $0x18] sm:$0xff] %v1150_v51  ;;  %v3441_v35 = vmul.f32 %v2581_v46, %v3290_v33  ;;  %v1166_v55 = vadd.f32 %v1134_v6, %v1102_v44  ;;  %v1103_v44 = vld [vmem:[#allocation2 + $0xe0] sm:$0xff] }
 0x2b5   : > { %v2583_v53 = vpop.eup %2582  ;;  %v1000_v30 = vpop.xlane.xlu1 %999  ;;  %2333 = vmatmul.mubr.f32.gmra.mxu0 %v3426_v63  ;;  %v1214_v10 = vmul.f32 %v1024_v25, %v1024_v25 }
 0x2b6   : > { %v1149_v37 = vadd.f32 %v1117_v50, %v1085_v52  ;;  %2596 = vrcp.f32 %v1000_v30  ;;  %v1133_v56 = vand.u32 2147483647, %v3441_v35  ;;  %1306 = vst [vmem:[%s3074_s9 + $0x90] sm:$0xff] %v3441_v35  ;;  %2388 = vmatprep.mubr.f32.mxu1 %v3441_v35  ;;  %1198 = vst [vmem:[#allocation2 + $0xc8] sm:$0xff] %v1166_v55  ;;  %v3450_v1 = vmul.f32 %v2583_v53, %v3298_v34  ;;  %v1090_v53 = vld [vmem:[#allocation2 + $0x48] sm:$0xff] }
 0x2b7   : > { %v2585_v61 = vpop.eup %2584  ;;  %2389 = vmatmul.mubr.f32.gmra.mxu1 %v3433_v40  ;;  %v974_v33 = vpop.xlane.xlu0 %973  ;;  %v1215_v55 = vmul.f32 %v3426_v63, %v3426_v63  ;;  %v1089_v63 = vld [vmem:[#allocation2 + $0x30] sm:$0xff] }
 0x2b8   : > { %1181 = vst [vmem:[#allocation2 + $0xd8] sm:$0xff] %v1149_v37  ;;  %v1165_v13 = vadd.f32 %v1133_v56, %v1101_v7  ;;  %2598 = vrcp.f32 %v974_v33  ;;  %v3453_v8 = vmul.f32 %v2585_v61, %v3303_v58  ;;  %v1120_v60 = vand.u32 2147483647, %v3450_v1  ;;  %1293 = vst [vmem:[%s3074_s9 + $0x28] sm:$0xff] %v3450_v1  ;;  %v1106_v33 = vld [vmem:[#allocation2 + $0xc0] sm:$0xff] }
 0x2b9   : > { %v2587_v59 = vpop.eup %2586  ;;  %v1006_v11 = vpop.xlane.xlu1 %1005 }
 0x2ba   : > { %1197 = vst [vmem:[#allocation2 + $0x40] sm:$0xff] %v1165_v13  ;;  %2600 = vrcp.f32 %v1006_v11  ;;  %v1028_v34 = vmul.f32 %v2587_v59, %v3308_v2  ;;  %v1136_v12 = vand.u32 2147483647, %v3453_v8  ;;  %1309 = vst [vmem:[%s3074_s9 + $0xa8] sm:$0xff] %v3453_v8  ;;  %v1152_v47 = vadd.f32 %v1120_v60, %v1088_v4 }
 0x2bb   : > { %v2589_v58 = vpop.eup %2588  ;;  %v972_v22 = vpop.xlane.xlu0 %971 }
 0x2bc   : > { %2602 = vrcp.f32 %v972_v22  ;;  %v1119_v36 = vand.u32 2147483647, %v1028_v34  ;;  %1292 = vst [vmem:[%s3074_s9 + $0x20] sm:$0xff] %v1028_v34  ;;  %2335 = vmatprep.mubr.f32.mxu0 %v1028_v34  ;;  %v3468_v2 = vmul.f32 %v2589_v58, %v3314_v18  ;;  %1184 = vst [vmem:[#allocation2 + $0x68] sm:$0xff] %v1152_v47  ;;  %v1168_v3 = vadd.f32 %v1136_v12, %v1104_v41  ;;  %v1105_v12 = vld [vmem:[#allocation2 + $0x70] sm:$0xff] }
 0x2bd   : > { %v2591_v29 = vpop.eup %2590  ;;  %v1004_v51 = vpop.xlane.xlu1 %1003  ;;  %2336 = vmatmul.mubr.f32.gmra.mxu0 %v3450_v1  ;;  %v1245_v18 = vadd.f32 %v1244_v39, %v1214_v10  ;;  %v1216_v37 = vmul.f32 %v1028_v34, %v1028_v34  ;;  %v1092_v39 = vld [vmem:[#allocation2 + $0x88] sm:$0xff] }
 0x2be   : > { %v1151_v25 = vadd.f32 %v1119_v36, %v1087_v19  ;;  %2604 = vrcp.f32 %v1004_v51  ;;  %v1135_v46 = vand.u32 2147483647, %v3468_v2  ;;  %1308 = vst [vmem:[%s3074_s9 + $0xa0] sm:$0xff] %v3468_v2  ;;  %2391 = vmatprep.mubr.f32.mxu1 %v3468_v2  ;;  %1200 = vst [vmem:[#allocation2 + $0x90] sm:$0xff] %v1168_v3  ;;  %v3477_v6 = vmul.f32 %v2591_v29, %v3320_v42 }
 0x2bf   : > { %v2593_v48 = vpop.eup %2592  ;;  %2392 = vmatmul.mubr.f32.gmra.mxu1 %v3453_v8  ;;  %v978_v52 = vpop.xlane.xlu0 %977  ;;  %v1246_v4 = vadd.f32 %v1245_v18, %v1215_v55 }
 0x2c0   : > { %1183 = vst [vmem:[#allocation2 + $0x50] sm:$0xff] %v1151_v25  ;;  %v1167_v50 = vadd.f32 %v1135_v46, %v1103_v44  ;;  %2606 = vrcp.f32 %v978_v52  ;;  %v3480_v30 = vmul.f32 %v2593_v48, %v3325_v27  ;;  %v1122_v61 = vand.u32 2147483647, %v3477_v6  ;;  %1295 = vst [vmem:[%s3074_s9 + $0x38] sm:$0xff] %v3477_v6  ;;  %v1108_v48 = vld [vmem:[#allocation2 + $0xd0] sm:$0xff] }
 0x2c1   : > { %v2595_v7 = vpop.eup %2594  ;;  %v1010_v56 = vpop.xlane.xlu1 %1009 }
 0x2c2   : > { %1199 = vst [vmem:[#allocation2 + $0xe0] sm:$0xff] %v1167_v50  ;;  %2608 = vrcp.f32 %v1010_v56  ;;  %v1032_v42 = vmul.f32 %v2595_v7, %v3330_v32  ;;  %v1138_v13 = vand.u32 2147483647, %v3480_v30  ;;  %1311 = vst [vmem:[%s3074_s9 + $0xb8] sm:$0xff] %v3480_v30  ;;  %v1154_v5 = vadd.f32 %v1122_v61, %v1090_v53 }
 0x2c3   : > { %v2597_v27 = vpop.eup %2596  ;;  %v976_v59 = vpop.xlane.xlu0 %975  ;;  %v1247_v32 = vadd.f32 %v1246_v4, %v1216_v37 }
 0x2c4   : > { %2610 = vrcp.f32 %v976_v59  ;;  %v1121_v11 = vand.u32 2147483647, %v1032_v42  ;;  %1294 = vst [vmem:[%s3074_s9 + $0x30] sm:$0xff] %v1032_v42  ;;  %2338 = vmatprep.mubr.f32.mxu0 %v1032_v42  ;;  %v3493_v60 = vmul.f32 %v2597_v27, %v3336_v43  ;;  %1186 = vst [vmem:[#allocation2 + $0x48] sm:$0xff] %v1154_v5  ;;  %v1170_v58 = vadd.f32 %v1138_v13, %v1106_v33  ;;  %v1094_v5 = vld [vmem:[#allocation2 + $0xb8] sm:$0xff] }
 0x2c5   : > { %v2599_v34 = vpop.eup %2598  ;;  %v1008_v41 = vpop.xlane.xlu1 %1007  ;;  %2339 = vmatmul.mubr.f32.gmra.mxu0 %v3477_v6  ;;  %v1217_v43 = vmul.f32 %v3450_v1, %v3450_v1  ;;  %v1218_v19 = vmul.f32 %v1032_v42, %v1032_v42  ;;  %v1107_v42 = vld [vmem:[#allocation2 + $0xa8] sm:$0xff] }
 0x2c6   : > { %v1153_v16 = vadd.f32 %v1121_v11, %v1089_v63  ;;  %2612 = vrcp.f32 %v1008_v41  ;;  %v1137_v10 = vand.u32 2147483647, %v3493_v60  ;;  %1310 = vst [vmem:[%s3074_s9 + $0xb0] sm:$0xff] %v3493_v60  ;;  %2394 = vmatprep.mubr.f32.mxu1 %v3493_v60  ;;  %1202 = vst [vmem:[#allocation2 + $0xc0] sm:$0xff] %v1170_v58  ;;  %v1038_v36 = vmul.f32 %v2599_v34, %v3342_v49 }
 0x2c7   : > { %v2601_v22 = vpop.eup %2600  ;;  %2395 = vmatmul.mubr.f32.gmra.mxu1 %v3480_v30  ;;  %v982_v47 = vpop.xlane.xlu0 %981  ;;  %v1248_v3 = vadd.f32 %v1247_v32, %v1217_v43 }
 0x2c8   : > { %1185 = vst [vmem:[#allocation2 + $0x30] sm:$0xff] %v1153_v16  ;;  %v1169_v29 = vadd.f32 %v1137_v10, %v1105_v12  ;;  %2614 = vrcp.f32 %v982_v47  ;;  %v3505_v51 = vmul.f32 %v2601_v22, %v3346_v54  ;;  %v1124_v1 = vand.u32 2147483647, %v1038_v36  ;;  %1297 = vst [vmem:[%s3074_s9 + $0x48] sm:$0xff] %v1038_v36  ;;  %v1091_v54 = vld [vmem:[#allocation2 + $0x80] sm:$0xff]  ;;  %v1110_v16 = vld [vmem:[#allocation2 + $0x28] sm:$0xff] }
 0x2c9   : > { %v2603_v44 = vpop.eup %2602  ;;  %v1014_v25 = vpop.xlane.xlu1 %1013  ;;  %v1249_v52 = vadd.f32 %v1248_v3, %v1218_v19  ;;  %v1221_v22 = vmul.f32 %v1038_v36, %v1038_v36 }
 0x2ca   : > { %1201 = vst [vmem:[#allocation2 + $0x70] sm:$0xff] %v1169_v29  ;;  %2616 = vrcp.f32 %v1014_v25  ;;  %v1036_v46 = vmul.f32 %v2603_v44, %v3351_v57  ;;  %v1140_v49 = vand.u32 2147483647, %v3505_v51  ;;  %1313 = vst [vmem:[%s3074_s9 + $0xc8] sm:$0xff] %v3505_v51  ;;  %v1156_v53 = vadd.f32 %v1124_v1, %v1092_v39  ;;  %v1109_v25 = vld [vmem:[#allocation2 + $0x10] sm:$0xff] }
 0x2cb   : > { %v2605_v18 = vpop.eup %2604  ;;  %v980_v50 = vpop.xlane.xlu0 %979  ;;  %v1219_v57 = vmul.f32 %v3477_v6, %v3477_v6 }
 0x2cc   : > { %2618 = vrcp.f32 %v980_v50  ;;  %v1123_v7 = vand.u32 2147483647, %v1036_v46  ;;  %1296 = vst [vmem:[%s3074_s9 + $0x40] sm:$0xff] %v1036_v46  ;;  %2341 = vmatprep.mubr.f32.mxu0 %v1036_v46  ;;  %v3514_v55 = vmul.f32 %v2605_v18, %v3356_v38  ;;  %v1220_v56 = vmul.f32 %v1036_v46, %v1036_v46  ;;  %1188 = vst [vmem:[#allocation2 + $0x88] sm:$0xff] %v1156_v53 }
 0x2cd   : > { %v2607_v37 = vpop.eup %2606  ;;  %v1012_v61 = vpop.xlane.xlu1 %1011  ;;  %2342 = vmatmul.mubr.f32.gmra.mxu0 %v1038_v36  ;;  %v1172_v33 = vadd.f32 %v1140_v49, %v1108_v48  ;;  %v1250_v4 = vadd.f32 %v1249_v52, %v1219_v57  ;;  %v1096_v52 = vld [vmem:[#allocation2 + $0xf0] sm:$0xff] }
 0x2ce   : > { %v1155_v13 = vadd.f32 %v1123_v7, %v1091_v54  ;;  %2620 = vrcp.f32 %v1012_v61  ;;  %v1139_v27 = vand.u32 2147483647, %v3514_v55  ;;  %1312 = vst [vmem:[%s3074_s9 + $0xc0] sm:$0xff] %v3514_v55  ;;  %2397 = vmatprep.mubr.f32.mxu1 %v3514_v55  ;;  %v1042_v59 = vmul.f32 %v2607_v37, %v3360_v17  ;;  %v1112_v37 = vld [vmem:[#allocation2 + $0xf8] sm:$0xff] }
 0x2cf   : > { %v2609_v38 = vpop.eup %2608  ;;  %1204 = vst [vmem:[#allocation2 + $0xd0] sm:$0xff] %v1172_v33  ;;  %2398 = vmatmul.mubr.f32.gmra.mxu1 %v3505_v51  ;;  %v984_v6 = vpop.xlane.xlu0 %983  ;;  %v1251_v32 = vadd.f32 %v1250_v4, %v1220_v56 }
 0x2d0   : > { %1187 = vst [vmem:[#allocation2 + $0x80] sm:$0xff] %v1155_v13  ;;  %v1171_v63 = vadd.f32 %v1139_v27, %v1107_v42  ;;  %2622 = vrcp.f32 %v984_v6  ;;  %v3525_v11 = vmul.f32 %v2609_v38, %v3364_v21  ;;  %v1126_v12 = vand.u32 2147483647, %v1042_v59  ;;  %1299 = vst [vmem:[%s3074_s9 + $0x58] sm:$0xff] %v1042_v59  ;;  %v1093_v21 = vld [vmem:[#allocation2 + $0xe8] sm:$0xff]  ;;  %v1095_v42 = vld [vmem:[#allocation2 + $0x60] sm:$0xff] }
 0x2d1   : > { %v2611_v34 = vpop.eup %2610  ;;  %v1016_v41 = vpop.xlane.xlu1 %1015  ;;  %v1252_v44 = vadd.f32 %v1251_v32, %v1221_v22  ;;  %v1223_v53 = vmul.f32 %v1042_v59, %v1042_v59  ;;  %v1111_v6 = vld [vmem:[#allocation2 + $0xa0] sm:$0xff]  ;;  %v1097_v32 = vld [vmem:[#allocation2 + $0x8] sm:$0xff] }
 0x2d2   : > { %1203 = vst [vmem:[#allocation2 + $0xa8] sm:$0xff] %v1171_v63  ;;  %2624 = vrcp.f32 %v1016_v41  ;;  %v1040_v58 = vmul.f32 %v2611_v34, %v3368_v15  ;;  %v1142_v17 = vand.u32 2147483647, %v3525_v11  ;;  %1315 = vst [vmem:[%s3074_s9 + $0xd8] sm:$0xff] %v3525_v11  ;;  %v1158_v19 = vadd.f32 %v1126_v12, %v1094_v5 }
 0x2d3   : > { %v2613_v10 = vpop.eup %2612  ;;  %v986_v43 = vpop.xlane.xlu0 %985 }
 0x2d4   : > { %2626 = vrcp.f32 %v986_v43  ;;  %v1125_v47 = vand.u32 2147483647, %v1040_v58  ;;  %v1222_v29 = vmul.f32 %v1040_v58, %v1040_v58  ;;  %1298 = vst [vmem:[%s3074_s9 + $0x50] sm:$0xff] %v1040_v58  ;;  %2344 = vmatprep.mubr.f32.mxu0 %v1040_v58  ;;  %v3534_v39 = vmul.f32 %v2613_v10, %v3371_v20  ;;  %1190 = vst [vmem:[#allocation2 + $0xb8] sm:$0xff] %v1158_v19  ;;  %v1113_v43 = vld [vmem:[#allocation2 + $0x20] sm:$0xff] }
 0x2d5   : > { %v2615_v15 = vpop.eup %2614  ;;  %v1018_v3 = vpop.xlane.xlu1 %1017  ;;  %2345 = vmatmul.mubr.f32.gmra.mxu0 %v1042_v59  ;;  %v1174_v1 = vadd.f32 %v1142_v17, %v1110_v16 }
 0x2d6   : > { %v1157_v36 = vadd.f32 %v1125_v47, %v1093_v21  ;;  %2628 = vrcp.f32 %v1018_v3  ;;  %v1141_v46 = vand.u32 2147483647, %v3534_v39  ;;  %1314 = vst [vmem:[%s3074_s9 + $0xd0] sm:$0xff] %v3534_v39  ;;  %2400 = vmatprep.mubr.f32.mxu1 %v3534_v39  ;;  %v1253_v49 = vadd.f32 %v1252_v44, %v1222_v29  ;;  %v1098_v47 = vld [vmem:[#allocation2 + $0x78] sm:$0xff] }
 0x2d7   : > { %v2617_v48 = vpop.eup %2616  ;;  %1206 = vst [vmem:[#allocation2 + $0x28] sm:$0xff] %v1174_v1  ;;  %2401 = vmatmul.mubr.f32.gmra.mxu1 %v3525_v11  ;;  %v1046_v20 = vmul.f32 %v2615_v15, %v3374_v62  ;;  %v1228_v1 = vmul.f32 %v3419_v14, %v3419_v14  ;;  %v1231_v14 = vmul.f32 %v3433_v40, %v3433_v40 }
 0x2d8   : > { %1189 = vst [vmem:[#allocation2 + $0xe8] sm:$0xff] %v1157_v36  ;;  %v1173_v18 = vadd.f32 %v1141_v46, %v1109_v25  ;;  %v3543_v50 = vmul.f32 %v2617_v48, %v3377_v0  ;;  %v1254_v61 = vadd.f32 %v1253_v49, %v1223_v53  ;;  %v1114_v25 = vld [vmem:[#allocation2 + $0x98] sm:$0xff]  ;;  %v1229_v48 = vmul.f32 %v3405_v9, %v3405_v9 }
 0x2d9   : > { %v2619_v54 = vpop.eup %2618  ;;  %v1128_v7 = vand.u32 2147483647, %v1046_v20  ;;  %1301 = vst [vmem:[%s3074_s9 + $0x68] sm:$0xff] %v1046_v20  ;;  %v1236_v40 = vmul.f32 %v3514_v55, %v3514_v55 }
 0x2da   : > { %1205 = vst [vmem:[#allocation2 + $0x10] sm:$0xff] %v1173_v18  ;;  %v1044_v57 = vmul.f32 %v2619_v54, %v3380_v23  ;;  %v1144_v56 = vand.u32 2147483647, %v3543_v50  ;;  %1317 = vst [vmem:[%s3074_s9 + $0xe8] sm:$0xff] %v3543_v50  ;;  %v1225_v23 = vmul.f32 %v1046_v20, %v1046_v20  ;;  %v1232_v54 = vmul.f32 %v3468_v2, %v3468_v2 }
 0x2db   : > { %v2621_v62 = vpop.eup %2620  ;;  %v1160_v33 = vadd.f32 %v1128_v7, %v1096_v52  ;;  %v1233_v7 = vmul.f32 %v3453_v8, %v3453_v8  ;;  %v1237_v2 = vmul.f32 %v3505_v51, %v3505_v51  ;;  %v1238_v8 = vmul.f32 %v3534_v39, %v3534_v39 }
 0x2dc   : > { %v1127_v0 = vand.u32 2147483647, %v1044_v57  ;;  %v1224_v13 = vmul.f32 %v1044_v57, %v1044_v57  ;;  %1300 = vst [vmem:[%s3074_s9 + $0x60] sm:$0xff] %v1044_v57  ;;  %2347 = vmatprep.mubr.f32.mxu0 %v1044_v57  ;;  %v3552_v27 = vmul.f32 %v2621_v62, %v3383_v24  ;;  %v1176_v38 = vadd.f32 %v1144_v56, %v1112_v37 }
 0x2dd   : > { %v2623_v4 = vpop.eup %2622  ;;  %1192 = vst [vmem:[#allocation2 + $0xf0] sm:$0xff] %v1160_v33  ;;  %2348 = vmatmul.mubr.f32.gmra.mxu0 %v1046_v20  ;;  %v1234_v37 = vmul.f32 %v3493_v60, %v3493_v60  ;;  %v1239_v60 = vmul.f32 %v3525_v11, %v3525_v11  ;;  %v1241_v51 = vmul.f32 %v3543_v50, %v3543_v50 }
 0x2de   : > { %v1159_v59 = vadd.f32 %v1127_v0, %v1095_v42  ;;  %v1255_v63 = vadd.f32 %v1254_v61, %v1224_v13  ;;  %v1143_v5 = vand.u32 2147483647, %v3552_v27  ;;  %1316 = vst [vmem:[%s3074_s9 + $0xe0] sm:$0xff] %v3552_v27  ;;  %2403 = vmatprep.mubr.f32.mxu1 %v3552_v27  ;;  %1208 = vst [vmem:[#allocation2 + $0xf8] sm:$0xff] %v1176_v38 }
 0x2df   : > { %v1048_v34 = vmul.f32 %v2623_v4, %v3386_v45  ;;  %v2625_v24 = vpop.eup %2624  ;;  %2404 = vmatmul.mubr.f32.gmra.mxu1 %v3543_v50 }
 0x2e0   : > { %1191 = vst [vmem:[#allocation2 + $0x60] sm:$0xff] %v1159_v59  ;;  %v1256_v41 = vadd.f32 %v1255_v63, %v1225_v23  ;;  %v1175_v12 = vadd.f32 %v1143_v5, %v1111_v6  ;;  %v1080_v10 = vmul.f32 %v2625_v24, %v3389_v28 }
 0x2e1   : > { %v1129_v58 = vand.u32 2147483647, %v1048_v34  ;;  %v1226_v16 = vmul.f32 %v1048_v34, %v1048_v34  ;;  %1302 = vst [vmem:[%s3074_s9 + $0x70] sm:$0xff] %v1048_v34  ;;  %2350 = vmatprep.mubr.f32.mxu0 %v1048_v34  ;;  %v2627_v17 = vpop.eup %2626 }
 0x2e2   : > { %1207 = vst [vmem:[#allocation2 + $0xa0] sm:$0xff] %v1175_v12  ;;  %v1050_v45 = vmul.f32 %v2627_v17, %v3392_v26  ;;  %v1145_v19 = vand.u32 2147483647, %v1080_v10  ;;  %1318 = vst [vmem:[%s3074_s9 + $0xf0] sm:$0xff] %v1080_v10  ;;  %2406 = vmatprep.mubr.f32.mxu1 %v1080_v10  ;;  %v1242_v13 = vmul.f32 %v1080_v10, %v1080_v10 }
 0x2e3   : > { %v1161_v22 = vadd.f32 %v1129_v58, %v1097_v32  ;;  %v2629_v21 = vpop.eup %2628  ;;  %v1257_v29 = vadd.f32 %v1256_v41, %v1226_v16 }
 0x2e4   : > { %v1130_v15 = vand.u32 2147483647, %v1050_v45  ;;  %v1227_v44 = vmul.f32 %v1050_v45, %v1050_v45  ;;  %1303 = vst [vmem:[%s3074_s9 + $0x78] sm:$0xff] %v1050_v45  ;;  %2351 = vmatmul.mubr.f32.gmra.mxu0 %v1050_v45  ;;  %v1082_v3 = vmul.f32 %v2629_v21, %v3395_v31  ;;  %v1177_v28 = vadd.f32 %v1145_v19, %v1113_v43 }
 0x2e5   : > { %1193 = vst [vmem:[#allocation2 + $0x8] sm:$0xff] %v1161_v22  ;;  %v1230_v31 = vmul.f32 %v3441_v35, %v3441_v35  ;;  %v1235_v35 = vmul.f32 %v3480_v30, %v3480_v30  ;;  %v1240_v30 = vmul.f32 %v3552_v27, %v3552_v27 }
 0x2e6   : > { %v1162_v26 = vadd.f32 %v1130_v15, %v1098_v47  ;;  %v1258_v36 = vadd.f32 %v1257_v29, %v1227_v44  ;;  %v1146_v46 = vand.u32 2147483647, %v1082_v3  ;;  %1319 = vst [vmem:[%s3074_s9 + $0xf8] sm:$0xff] %v1082_v3  ;;  %2407 = vmatmul.mubr.f32.gmra.mxu1 %v1082_v3  ;;  %1209 = vst [vmem:[#allocation2 + $0x20] sm:$0xff] %v1177_v28 }
 0x2e7   : > { %v1243_v39 = vmul.f32 %v1082_v3, %v1082_v3 }
 0x2e8   : > { %1194 = vst [vmem:[#allocation2 + $0x78] sm:$0xff] %v1162_v26  ;;  %v1259_v49 = vadd.f32 %v1258_v36, %v1228_v1  ;;  %v1178_v20 = vadd.f32 %v1146_v46, %v1114_v25 }
 0x2ea   : > { %v1260_v18 = vadd.f32 %v1259_v49, %v1229_v48  ;;  %1210 = vst [vmem:[#allocation2 + $0x98] sm:$0xff] %v1178_v20 }
 0x2ec   : > { %v1261_v52 = vadd.f32 %v1260_v18, %v1230_v31 }
 0x2ee   : > { %v1262_v53 = vadd.f32 %v1261_v52, %v1231_v14 }
 0x2f0   : > { %v1263_v9 = vadd.f32 %v1262_v53, %v1232_v54  ;;  %v1211_v54 = vld [vmem:[#allocation12] sm:$0x1] }
 0x2f2   : > { %v1264_v57 = vadd.f32 %v1263_v9, %v1233_v7 }
 0x2f4   : > { %v1265_v56 = vadd.f32 %v1264_v57, %v1234_v37 }
 0x2f6   : > { %v1266_v62 = vadd.f32 %v1265_v56, %v1235_v35 }
 0x2f8   : > { %v1267_v61 = vadd.f32 %v1266_v62, %v1236_v40 }
 0x2fa   : > { %v1268_v42 = vadd.f32 %v1267_v61, %v1237_v2 }
 0x2fc   : > { %v1269_v33 = vadd.f32 %v1268_v42, %v1238_v8 }
 0x2fe   : > { %v1270_v55 = vadd.f32 %v1269_v33, %v1239_v60 }
 0x300   : > { %v1271_v0 = vadd.f32 %v1270_v55, %v1240_v30 }
 0x302   : > { %v1272_v38 = vadd.f32 %v1271_v0, %v1241_v51 }
 0x304   : > { %v1273_v4 = vadd.f32 %v1272_v38, %v1242_v13 }
 0x306   : > { %v1274_v23 = vadd.f32 %v1273_v4, %v1243_v39 }
 0x308   : > { %1275 = vadd.xlane.f32.xlu0 %v1274_v23 }
 0x36c   : > { %v2331_v11 = vpop.f32.mrf.mxu0 }
 0x36d   : > { %1643 = vst [vmem:[%s3072_s25 + $0x8] sm:$0xff] %v2331_v11 }
 0x36e   : > { %v1418_v27 = vpop.f32.mrf.mxu0 }
 0x36f   : > { %1642 = vst [vmem:[%s3072_s25] sm:$0xff] %v1418_v27  ;;  %v2387_v6 = vpop.f32.mrf.mxu1 }
 0x370   : > { %1659 = vst [vmem:[%s3072_s25 + $0x88] sm:$0xff] %v2387_v6 }
 0x371   : > { %v1563_v50 = vpop.f32.mrf.mxu1 }
 0x372   : > { %1658 = vst [vmem:[%s3072_s25 + $0x80] sm:$0xff] %v1563_v50 }
 0x375   : > { %v2334_v59 = vpop.f32.mrf.mxu0 }
 0x376   : > { %1645 = vst [vmem:[%s3072_s25 + $0x18] sm:$0xff] %v2334_v59 }
 0x377   : > { %v1428_v63 = vpop.f32.mrf.mxu0  ;;  %v2390_v5 = vpop.f32.mrf.mxu1 }
 0x378   : > { %1644 = vst [vmem:[%s3072_s25 + $0x10] sm:$0xff] %v1428_v63  ;;  %1661 = vst [vmem:[%s3072_s25 + $0x98] sm:$0xff] %v2390_v5 }
 0x379   : > { %v1573_v34 = vpop.f32.mrf.mxu1 }
 0x37a   : > { %1660 = vst [vmem:[%s3072_s25 + $0x90] sm:$0xff] %v1573_v34 }
 0x37d   : > { %v2337_v24 = vpop.f32.mrf.mxu0 }
 0x37e   : > { %1647 = vst [vmem:[%s3072_s25 + $0x28] sm:$0xff] %v2337_v24 }
 0x37f   : > { %v1438_v32 = vpop.f32.mrf.mxu0  ;;  %v2393_v41 = vpop.f32.mrf.mxu1 }
 0x380   : > { %1646 = vst [vmem:[%s3072_s25 + $0x20] sm:$0xff] %v1438_v32  ;;  %1663 = vst [vmem:[%s3072_s25 + $0xa8] sm:$0xff] %v2393_v41 }
 0x381   : > { %v1583_v12 = vpop.f32.mrf.mxu1 }
 0x382   : > { %1662 = vst [vmem:[%s3072_s25 + $0xa0] sm:$0xff] %v1583_v12 }
 0x385   : > { %v2340_v58 = vpop.f32.mrf.mxu0 }
 0x386   : > { %1649 = vst [vmem:[%s3072_s25 + $0x38] sm:$0xff] %v2340_v58 }
 0x387   : > { %v1448_v16 = vpop.f32.mrf.mxu0  ;;  %v2396_v17 = vpop.f32.mrf.mxu1 }
 0x388   : > { %1648 = vst [vmem:[%s3072_s25 + $0x30] sm:$0xff] %v1448_v16  ;;  %1665 = vst [vmem:[%s3072_s25 + $0xb8] sm:$0xff] %v2396_v17 }
 0x389   : > { %v1593_v10 = vpop.f32.mrf.mxu1 }
 0x38a   : > { %1664 = vst [vmem:[%s3072_s25 + $0xb0] sm:$0xff] %v1593_v10 }
 0x38d   : > { %v2343_v22 = vpop.f32.mrf.mxu0 }
 0x38e   : > { %1651 = vst [vmem:[%s3072_s25 + $0x48] sm:$0xff] %v2343_v22 }
 0x38f   : > { %v1458_v43 = vpop.f32.mrf.mxu0  ;;  %v2399_v45 = vpop.f32.mrf.mxu1 }
 0x390   : > { %1650 = vst [vmem:[%s3072_s25 + $0x40] sm:$0xff] %v1458_v43  ;;  %1667 = vst [vmem:[%s3072_s25 + $0xc8] sm:$0xff] %v2399_v45 }
 0x391   : > { %v1603_v21 = vpop.f32.mrf.mxu1  ;;  %v1276_v19 = vpop.xlane.xlu0 %1275 }
 0x392   : > { %1666 = vst [vmem:[%s3072_s25 + $0xc0] sm:$0xff] %v1603_v21  ;;  %v1277_v47 = vrot.slane %v1276_v19, 4 }
 0x394   : > { %v1278_v29 = vadd.f32 %v1277_v47, %v1276_v19 }
 0x395   : > { %v2346_v15 = vpop.f32.mrf.mxu0 }
 0x396   : > { %v1279_v44 = vrot.slane %v1278_v29, 2  ;;  %1653 = vst [vmem:[%s3072_s25 + $0x58] sm:$0xff] %v2346_v15 }
 0x397   : > { %v1468_v3 = vpop.f32.mrf.mxu0  ;;  %v2402_v28 = vpop.f32.mrf.mxu1 }
 0x398   : > { %1652 = vst [vmem:[%s3072_s25 + $0x50] sm:$0xff] %v1468_v3  ;;  %1669 = vst [vmem:[%s3072_s25 + $0xd8] sm:$0xff] %v2402_v28  ;;  %v1280_v25 = vadd.f32 %v1279_v44, %v1278_v29 }
 0x399   : > { %v1613_v1 = vpop.f32.mrf.mxu1 }
 0x39a   : > { %1668 = vst [vmem:[%s3072_s25 + $0xd0] sm:$0xff] %v1613_v1  ;;  %v1281_v26 = vrot.slane %v1280_v25, 1 }
 0x39c   : > { %v1282_v36 = vadd.f32 %v1281_v26, %v1280_v25 }
 0x39d   : > { %v2349_v46 = vpop.f32.mrf.mxu0 }
 0x39e   : > { %1655 = vst [vmem:[%s3072_s25 + $0x68] sm:$0xff] %v2349_v46  ;;  %2409 = vpush %v1282_v36 }
 0x39f   : > { %v1478_v48 = vpop.f32.mrf.mxu0  ;;  %v2405_v49 = vpop.f32.mrf.mxu1 }
 0x3a0   : > { %1654 = vst [vmem:[%s3072_s25 + $0x60] sm:$0xff] %v1478_v48  ;;  %1671 = vst [vmem:[%s3072_s25 + $0xe8] sm:$0xff] %v2405_v49 }
 0x3a1   : > { %v1623_v20 = vpop.f32.mrf.mxu1 }
 0x3a2   : > { %1670 = vst [vmem:[%s3072_s25 + $0xe0] sm:$0xff] %v1623_v20 }
 0x3a4   : > { %v2352_v31 = vpop.f32.mrf.mxu0 }
 0x3a5   : > { %1657 = vst [vmem:[%s3072_s25 + $0x78] sm:$0xff] %v2352_v31 }
 0x3a6   : > { %v1488_v18 = vpop.f32.mrf.mxu0  ;;  %v2408_v14 = vpop.f32.mrf.mxu1 }
 0x3a7   : > { %1656 = vst [vmem:[%s3072_s25 + $0x70] sm:$0xff] %v1488_v18  ;;  %1673 = vst [vmem:[%s3072_s25 + $0xf8] sm:$0xff] %v2408_v14 }
 0x3a8   : > { %v1633_v52 = vpop.f32.mrf.mxu1 }
 0x3a9   : > { %1672 = vst [vmem:[%s3072_s25 + $0xf0] sm:$0xff] %v1633_v52 }
 0x3cf   : > { %s2410_s30 = spop %2409  ;;  %1677 = sbr.rel (%p2034_p8) target bundleno = 1249 (0x4e1), region = 52 }
 0x3d0   : > { %v1284_v53 = vstv %s2410_s30 }
 0x3d1   : > { %v1285_v7 = vsub.f32 %v1211_v54, %v1284_v53 }
 0x3d3   : > { %1287 = vst.msk [vmem:[#allocation12] sm:$0x1] %vm1286_vm1, %v1285_v7 }
 0x3d4   : > { %v1679_v9 = vld [vmem:[#allocation2 + $0xb0] sm:$0xff]  ;;  %v1680_v37 = vld [vmem:[#allocation2] sm:$0xff]  ;;  %v1681_v57 = vld [vmem:[#allocation2 + $0xd8] sm:$0xff] }
 0x3d5   : > { %v1682_v35 = vld [vmem:[#allocation2 + $0x18] sm:$0xff]  ;;  %v1711_v56 = vmul.f32 %v1679_v9, %v1679_v9  ;;  %v1712_v40 = vmul.f32 %v1680_v37, %v1680_v37  ;;  %v1713_v62 = vmul.f32 %v1681_v57, %v1681_v57  ;;  %v1683_v2 = vld [vmem:[#allocation2 + $0x50] sm:$0xff]  ;;  %v1684_v42 = vld [vmem:[#allocation2 + $0x68] sm:$0xff] }
 0x3d6   : > { %v1714_v61 = vmul.f32 %v1682_v35, %v1682_v35  ;;  %v1715_v60 = vmul.f32 %v1683_v2, %v1683_v2  ;;  %v1685_v30 = vld [vmem:[#allocation2 + $0x30] sm:$0xff]  ;;  %v1716_v55 = vmul.f32 %v1684_v42, %v1684_v42  ;;  %v1686_v0 = vld [vmem:[#allocation2 + $0x48] sm:$0xff]  ;;  %v1687_v39 = vld [vmem:[#allocation2 + $0x80] sm:$0xff] }
 0x3d7   : > { %v1743_v8 = vadd.f32 %v1712_v40, %v1711_v56  ;;  %v1717_v13 = vmul.f32 %v1685_v30, %v1685_v30  ;;  %v1718_v4 = vmul.f32 %v1686_v0, %v1686_v0  ;;  %v1688_v11 = vld [vmem:[#allocation2 + $0x88] sm:$0xff]  ;;  %v1719_v27 = vmul.f32 %v1687_v39, %v1687_v39  ;;  %v1690_v5 = vld [vmem:[#allocation2 + $0xb8] sm:$0xff]  ;;  %v1691_v32 = vld [vmem:[#allocation2 + $0x60] sm:$0xff] }
 0x3d8   : > { %v1689_v50 = vld [vmem:[#allocation2 + $0xe8] sm:$0xff]  ;;  %v1720_v59 = vmul.f32 %v1688_v11, %v1688_v11  ;;  %v1722_v41 = vmul.f32 %v1690_v5, %v1690_v5  ;;  %v1692_v58 = vld [vmem:[#allocation2 + $0xf0] sm:$0xff]  ;;  %v1723_v16 = vmul.f32 %v1691_v32, %v1691_v32  ;;  %v1694_v45 = vld [vmem:[#allocation2 + $0x78] sm:$0xff] }
 0x3d9   : > { %v1744_v33 = vadd.f32 %v1743_v8, %v1713_v62  ;;  %v1721_v34 = vmul.f32 %v1689_v50, %v1689_v50  ;;  %v1693_v10 = vld [vmem:[#allocation2 + $0x8] sm:$0xff]  ;;  %v1724_v22 = vmul.f32 %v1692_v58, %v1692_v58  ;;  %v1695_v47 = vld [vmem:[#allocation2 + $0x38] sm:$0xff]  ;;  %v1726_v29 = vmul.f32 %v1694_v45, %v1694_v45  ;;  %v1697_v25 = vld [vmem:[#allocation2 + $0x40] sm:$0xff] }
 0x3da   : > { %v1725_v21 = vmul.f32 %v1693_v10, %v1693_v10  ;;  %v1696_v44 = vld [vmem:[#allocation2 + $0x58] sm:$0xff]  ;;  %v1727_v3 = vmul.f32 %v1695_v47, %v1695_v47  ;;  %v1698_v36 = vld [vmem:[#allocation2 + $0xc8] sm:$0xff]  ;;  %v1729_v46 = vmul.f32 %v1697_v25, %v1697_v25  ;;  %v1699_v49 = vld [vmem:[#allocation2 + $0xe0] sm:$0xff] }
 0x3db   : > { %v1745_v51 = vadd.f32 %v1744_v33, %v1714_v61  ;;  %v1728_v1 = vmul.f32 %v1696_v44, %v1696_v44  ;;  %v1730_v20 = vmul.f32 %v1698_v36, %v1698_v36  ;;  %v1700_v18 = vld [vmem:[#allocation2 + $0x90] sm:$0xff]  ;;  %v1731_v14 = vmul.f32 %v1699_v49, %v1699_v49  ;;  %v1702_v9 = vld [vmem:[#allocation2 + $0xc0] sm:$0xff]  ;;  %v1703_v35 = vld [vmem:[#allocation2 + $0xa8] sm:$0xff] }
 0x3dc   : > { %v1701_v54 = vld [vmem:[#allocation2 + $0x70] sm:$0xff]  ;;  %v1732_v53 = vmul.f32 %v1700_v18, %v1700_v18  ;;  %v1734_v56 = vmul.f32 %v1702_v9, %v1702_v9  ;;  %v1735_v2 = vmul.f32 %v1703_v35, %v1703_v35  ;;  %v1706_v33 = vld [vmem:[#allocation2 + $0x28] sm:$0xff] }
 0x3dd   : > { %v1746_v38 = vadd.f32 %v1745_v51, %v1715_v60  ;;  %v1733_v37 = vmul.f32 %v1701_v54, %v1701_v54  ;;  %v1704_v62 = vld [vmem:[#allocation2 + $0xd0] sm:$0xff]  ;;  %v1707_v51 = vld [vmem:[#allocation2 + $0xa0] sm:$0xff]  ;;  %v1738_v0 = vmul.f32 %v1706_v33, %v1706_v33 }
 0x3de   : > { %v1705_v8 = vld [vmem:[#allocation2 + $0x10] sm:$0xff]  ;;  %v1736_v42 = vmul.f32 %v1704_v62, %v1704_v62  ;;  %v1739_v39 = vmul.f32 %v1707_v51, %v1707_v51 }
 0x3df   : > { %v1747_v23 = vadd.f32 %v1746_v38, %v1716_v55  ;;  %v1737_v30 = vmul.f32 %v1705_v8, %v1705_v8  ;;  %v1708_v38 = vld [vmem:[#allocation2 + $0xf8] sm:$0xff] }
 0x3e0   : > { %v1740_v11 = vmul.f32 %v1708_v38, %v1708_v38 }
 0x3e1   : > { %v1748_v6 = vadd.f32 %v1747_v23, %v1717_v13  ;;  %v1709_v23 = vld [vmem:[#allocation2 + $0x20] sm:$0xff] }
 0x3e2   : > { %v1741_v50 = vmul.f32 %v1709_v23, %v1709_v23 }
 0x3e3   : > { %v1749_v63 = vadd.f32 %v1748_v6, %v1718_v4  ;;  %v1710_v6 = vld [vmem:[#allocation2 + $0x98] sm:$0xff] }
 0x3e5   : > { %v1750_v24 = vadd.f32 %v1749_v63, %v1719_v27  ;;  %v1742_v63 = vmul.f32 %v1710_v6, %v1710_v6 }
 0x3e7   : > { %v1751_v12 = vadd.f32 %v1750_v24, %v1720_v59 }
 0x3e9   : > { %v1752_v17 = vadd.f32 %v1751_v12, %v1721_v34 }
 0x3eb   : > { %v1753_v43 = vadd.f32 %v1752_v17, %v1722_v41 }
 0x3ed   : > { %v1754_v19 = vadd.f32 %v1753_v43, %v1723_v16 }
 0x3ef   : > { %v1755_v15 = vadd.f32 %v1754_v19, %v1724_v22  ;;  %v1678_v22 = vld [vmem:[#allocation12] sm:$0x1] }
 0x3f1   : > { %v1756_v28 = vadd.f32 %v1755_v15, %v1725_v21 }
 0x3f3   : > { %v1757_v26 = vadd.f32 %v1756_v28, %v1726_v29 }
 0x3f5   : > { %v1758_v48 = vadd.f32 %v1757_v26, %v1727_v3 }
 0x3f7   : > { %v1759_v31 = vadd.f32 %v1758_v48, %v1728_v1 }
 0x3f9   : > { %v1760_v52 = vadd.f32 %v1759_v31, %v1729_v46 }
 0x3fb   : > { %v1761_v7 = vadd.f32 %v1760_v52, %v1730_v20 }
 0x3fd   : > { %v1762_v57 = vadd.f32 %v1761_v7, %v1731_v14 }
 0x3ff   : > { %v1763_v40 = vadd.f32 %v1762_v57, %v1732_v53 }
 0x401   : > { %v1764_v61 = vadd.f32 %v1763_v40, %v1733_v37 }
 0x403   : > { %v1765_v60 = vadd.f32 %v1764_v61, %v1734_v56 }
 0x405   : > { %v1766_v55 = vadd.f32 %v1765_v60, %v1735_v2 }
 0x407   : > { %v1767_v13 = vadd.f32 %v1766_v55, %v1736_v42 }
 0x409   : > { %v1768_v4 = vadd.f32 %v1767_v13, %v1737_v30 }
 0x40b   : > { %v1769_v27 = vadd.f32 %v1768_v4, %v1738_v0 }
 0x40d   : > { %v1770_v59 = vadd.f32 %v1769_v27, %v1739_v39 }
 0x40f   : > { %v1771_v5 = vadd.f32 %v1770_v59, %v1740_v11 }
 0x411   : > { %v1772_v34 = vadd.f32 %v1771_v5, %v1741_v50 }
 0x413   : > { %v1773_v24 = vadd.f32 %v1772_v34, %v1742_v63 }
 0x415   : > { %1774 = vadd.xlane.f32.xlu0 %v1773_v24 }
 0x49e   : > { %v1775_v32 = vpop.xlane.xlu0 %1774 }
 0x49f   : > { %v1776_v41 = vrot.slane %v1775_v32, 4 }
 0x4a1   : > { %v1777_v12 = vadd.f32 %v1776_v41, %v1775_v32 }
 0x4a3   : > { %v1778_v58 = vrot.slane %v1777_v12, 2 }
 0x4a5   : > { %v1779_v16 = vadd.f32 %v1778_v58, %v1777_v12 }
 0x4a7   : > { %v1780_v17 = vrot.slane %v1779_v16, 1 }
 0x4a9   : > { %v1781_v10 = vadd.f32 %v1780_v17, %v1779_v16 }
 0x4ab   : > { %2411 = vpush %v1781_v10 }
 0x4dc   : > { %s2412_s22 = spop %2411 }
 0x4dd   : > { %v1783_v43 = vstv %s2412_s22 }
 0x4de   : > { %v1784_v45 = vadd.f32 %v1783_v43, %v1678_v22 }
 0x4e0   : > { %1785 = vst.msk [vmem:[#allocation12] sm:$0x1] %vm1286_vm1, %v1784_v45 }
 0x4e1 PF: > { %s2054_s26 = sshll.u32 %s2848_s21, 12  ;;  %s1825_s14 = sshll.u32 %s3074_s9, 4  ;;  %s3639_s14 = int_to_ptr.vmem [resolvable:$true] %s1825_s14 }
 0x4e2   : > { %s3636_s15 = scalar_lea.hbm %s3743_s4, %s2054_s26  ;;  %s3643_s16 = scalar_lea.sflag [#allocation11], %s306_s7 }
 0x4e3   : > { %s2714_s1 = scalar_lea.vmem %s3639_s14, 4096  ;;  %s2864_s18 = smov [#allocation10]  }
 0x4e4   : > { %p2715_p3 = scmp.ne.s32.totalorder %s3639_s14, %s2714_s1  ;;  %s2718_s12 = sshll.u32 %s2864_s18, 4  ;;  %s2719_s12 = int_to_ptr.vmem [resolvable:$false] %s2718_s12 }
 0x4e5   : > { %s2720_s28 = scalar_lea.vmem %s2719_s12, 8192  ;;  %p2721_p13 = scmp.lt.s32.totalorder %s3639_s14, %s2719_s12 }
 0x4e6   : > { %p2716_p12 = pnand %p2715_p3, %p2956_p9  ;;  %p2722_p6 = scmp.lt.s32.totalorder %s2720_s28, %s2714_s1 }
 0x4e8   : > { %p2717_p10 = pneg %p2716_p12  ;;  %p2723_p1 = por %p2722_p6, %p2721_p13 }
 0x4ea   : > { %p2724_p2 = pnand %p2723_p1, %p2717_p10 }
 0x4ec   : > { %2727 = shalt.err (!%p2724_p2)
}
 0x4ed   : > { %s2728_s27 = scalar_lea.hbm %s3636_s15, 4096  ;;  %s2732_s29 = scalar_lea.hbm %s3743_s4, 8192 }
 0x4ee   : > { %p2729_p4 = scmp.ne.s32.totalorder %s3636_s15, %s2728_s27  ;;  %p2733_p0 = scmp.lt.s32.totalorder %s3636_s15, %s3743_s4 }
 0x4ef   : > { %p2734_p8 = scmp.lt.s32.totalorder %s2732_s29, %s2728_s27 }
 0x4f0   : > { %p2730_p5 = pnand %p2729_p4, %p2956_p9 }
 0x4f1   : > { %p2735_p3 = por %p2734_p8, %p2733_p0 }
 0x4f2   : > { %p2731_p7 = pneg %p2730_p5 }
 0x4f4   : > { %p2736_p12 = pnand %p2735_p3, %p2731_p7 }
 0x4f6   : > { %2739 = shalt.err (!%p2736_p12)
}
 0x4f7   : > { %s2865_s30 = smov 128   ;;  %s2866_s22 = smov 8  }
 0x4f8   : > { %2420 = dma.vmem_to_hbm [thread:$0]  (%p2956_p9), %s3639_s14, 4096, %s3636_s15, %s3643_s16, %s2865_s30, %s2865_s30, %s2866_s22  }
 0x4f9   : > { %s3674_s1 = scalar_lea.hbm %s3742_s3, %s2054_s26  ;;  %s1807_s18 = sshll.u32 %s3072_s25, 4  ;;  %s3677_s18 = int_to_ptr.vmem [resolvable:$true] %s1807_s18 }
 0x4fa   : > { %s1787_s12 = scalar_lea.sflag [#allocation5], %s3051_s10  ;;  %s2740_s28 = scalar_lea.vmem %s3677_s18, 4096 }
 0x4fb   : > { %p2741_p10 = scmp.ne.s32.totalorder %s3677_s18, %s2740_s28  ;;  %s2867_s27 = smov [#allocation9]  }
 0x4fc   : > { %s2744_s15 = sshll.u32 %s2867_s27, 4  ;;  %s2745_s15 = int_to_ptr.vmem [resolvable:$false] %s2744_s15 }
 0x4fd   : > { %p2742_p13 = pnand %p2741_p10, %p2956_p9  ;;  %s2746_s21 = scalar_lea.vmem %s2745_s15, 8192 }
 0x4fe   : > { %p2747_p1 = scmp.lt.s32.totalorder %s3677_s18, %s2745_s15  ;;  %p2748_p2 = scmp.lt.s32.totalorder %s2746_s21, %s2740_s28 }
 0x4ff   : > { %p2743_p6 = pneg %p2742_p13 }
 0x500   : > { %p2749_p4 = por %p2748_p2, %p2747_p1 }
 0x502   : > { %p2750_p5 = pnand %p2749_p4, %p2743_p6 }
 0x504   : > { %2753 = shalt.err (!%p2750_p5)
}
 0x505   : > { %s2754_s25 = scalar_lea.hbm %s3674_s1, 4096  ;;  %s2758_s14 = scalar_lea.hbm %s3742_s3, 8192 }
 0x506   : > { %p2755_p7 = scmp.ne.s32.totalorder %s3674_s1, %s2754_s25  ;;  %p2759_p3 = scmp.lt.s32.totalorder %s3674_s1, %s3742_s3 }
 0x507   : > { %p2760_p12 = scmp.lt.s32.totalorder %s2758_s14, %s2754_s25 }
 0x508   : > { %p2756_p0 = pnand %p2755_p7, %p2956_p9 }
 0x509   : > { %p2761_p10 = por %p2760_p12, %p2759_p3 }
 0x50a   : > { %p2757_p8 = pneg %p2756_p0 }
 0x50c   : > { %p2762_p13 = pnand %p2761_p10, %p2757_p8 }
 0x50e   : > { %2765 = shalt.err (!%p2762_p13)
}
 0x50f   : > { %2419 = dma.vmem_to_hbm [thread:$0]  (%p2956_p9), %s3677_s18, 4096, %s3674_s1, %s1787_s12, %s2865_s30, %s2865_s30, %s2866_s22  }
 0x510   : > { %s2868_s11 = smov [#allocation12]   ;;  %p3769_p1 = scmp.eq.s32.totalorder %s2930_s24, 1 }
 0x511   : > { %s1841_s29 = sshll.u32 %s2868_s11, 4  ;;  %s1842_s29 = int_to_ptr.vmem [resolvable:$true] %s1841_s29 }
 0x512   : > { %s2766_s13 = scalar_lea.vmem %s1842_s29, 16  ;;  %s2772_s9 = scalar_lea.vmem %s1842_s29, 32 }
 0x513   : > { %p2767_p6 = scmp.ne.s32.totalorder %s1842_s29, %s2766_s13  ;;  %p2773_p5 = scmp.lt.s32.totalorder %s1842_s29, %s1842_s29 }
 0x514   : > { %p2774_p7 = scmp.lt.s32.totalorder %s2772_s9, %s2766_s13 }
 0x515   : > { %p2768_p2 = pnand %p2767_p6, %p3769_p1 }
 0x516   : > { %p2775_p0 = por %p2774_p7, %p2773_p5 }
 0x517   : > { %p2769_p4 = pneg %p2768_p2 }
 0x519   : > { %p2776_p8 = pnand %p2775_p0, %p2769_p4 }
 0x51b   : > { %2779 = shalt.err (!%p2776_p8)
}
 0x51c   : > { %p3770_p3 = pmov %p3769_p1  ;;  %p3771_p9 = pmov %p3769_p1 }
 0x51e   : > { %2422 = dma.vmem_to_hbm [thread:$0]  (%p3770_p3), %s1842_s29, 16, %s3744_s5, [#allocation11]  }
 0x51f   : > { %2823 = dma.done.wait (%p3771_p9), [#allocation11], 16   ;;  %p3772_p12 = pmov %p3769_p1 }
 0x521   : > { %2825 = vsyncadd (%p3772_p12), [#allocation11], 4294967280 }
 0x522 PF: > { %s3773_s30 = sld [smem:[#allocation18_spill]]  ;;  %p3775_p10 = scmp.ge.s32.totalorder %s2856_s23, 2 }
 0x524   : > { %p2438_p13 = pnand %p3775_p10, %p2965_p11 }
 0x526   : > { %p2439_p6 = pneg %p2438_p13 }
 0x528   : > { %s1857_s17 = sand.u32 1, %s3773_s30  }
 0x529   : > { %s1858_s1 = scalar_lea.sflag [#allocation5], %s1857_s17 }
 0x52a   : > { %2827 = dma.done.wait (%p2439_p6), %s1858_s1, 4096  }
 0x52b   : > { %2829 = vsyncadd (%p2439_p6), %s1858_s1, 4294963200  ;;  %s3776_s18 = sadd.s32 4294967294, %s2856_s23  }
 0x52c   : > { %s1866_s12 = sand.u32 1, %s3776_s18  }
 0x52d   : > { %s1867_s28 = scalar_lea.sflag [#allocation11], %s1866_s12 }
 0x52e   : > { %2831 = dma.done.wait (%p2439_p6), %s1867_s28, 4096  }
 0x52f   : > { %2833 = vsyncadd (%p2439_p6), %s1867_s28, 4294963200  ;;  %s28_s23 = sadd.s32 1, %s2856_s23   ;;  %s3777_s24 = sld [smem:[#allocation21_spill]] }
 0x530   : > { %p25_p1 = scmp.ge.s32.totalorder %s28_s23, 4   ;;  %s3778_s21 = sld [smem:[#allocation19_spill]] }
 0x531   : > { %s3779_s22 = sld [smem:[#allocation20_spill]]  ;;  %s3780_s18 = smov %s2840_s19 }
 0x532   : > { %s3781_s19 = smov %s2844_s20  ;;  %27 = sbr.rel (!%p25_p1) target bundleno = 12 (0xc), region = 135 }
 0x535   : > { %s3782_s20 = smov %s3777_s24 }
 0x537   :  { %1872 = vsyncpa [#allocation4], 1 }
 0x538   :  { %1874 = vsyncpa [#allocation4 + $0x1], 1 }
 0x539   :  { %1875 = vsyncpa [#allocation7], 1 }
 0x53a   :  { %1877 = vsyncpa [#allocation7 + $0x1], 1 }
 0x53b   :  { %1878 = vsyncpa [#allocation5], 1 }
 0x53c   :  { %1880 = vsyncpa [#allocation5 + $0x1], 1 }
 0x53d   :  { %1881 = vsyncpa [#allocation11], 1 }
 0x53e   :  { %1883 = vsyncpa [#allocation11 + $0x1], 1 }

</bundles_post_ra>
